<compile_context>
chip_gen: v7x
topology: tpu7x:2x2x1
jax: 0.10.0
libtpu: 0.0.40
codegen_flags: <defaults>
</compile_context>

<pallas_src>
import functools

import jax
import jax.numpy as jnp
from jax import lax
from jax.experimental import pallas as pl
from jax.experimental.pallas import tpu as pltpu


def _round_up(x, m):
    return ((x + m - 1) // m) * m


def _tensorcores_per_chip():
    """Best-effort TensorCores-per-chip query (v7x: 2, v5e/v6e: 1)."""
    try:
        info = pltpu.get_tpu_info()
        for attr in ("num_cores", "num_tensorcores", "tensorcore_count",
                     "core_count", "cores_per_chip"):
            v = getattr(info, attr, None)
            if isinstance(v, int) and v > 0:
                return v
    except Exception:
        pass
    return 1  # conservative: treat as single-core (keep tiles large)


def _link_predictor_kernel(xi_ref, xj_ref,
                           w1_ref, b1_ref,
                           w2_ref, b2_ref,
                           w3_ref, b3_ref,
                           out_ref):
    # method == 'DOT': the reference row swap is a no-op (product commutes),
    # so it is omitted.  Elementwise math in f32 (native VPU on all chips,
    # including v5e which has no bf16 VALU); MXU operands cast per-tile below.
    x = xi_ref[...].astype(jnp.float32) * xj_ref[...].astype(jnp.float32)

    # Layer 1: Linear(C -> H) + ReLU  (weights pre-transposed to [C, H]).
    h = jnp.dot(x.astype(w1_ref.dtype), w1_ref[...],
                preferred_element_type=jnp.float32)
    h = jnp.maximum(h + b1_ref[...], 0.0)                            # [tm, H] f32

    # Layer 2: Linear(H -> H) + ReLU.
    h = jnp.dot(h.astype(w2_ref.dtype), w2_ref[...],
                preferred_element_type=jnp.float32)
    h = jnp.maximum(h + b2_ref[...], 0.0)                            # [tm, H] f32

    # Layer 3 (H -> 1): contract H of w3 [1, H] against H of h [tm, H];
    # the MXU emits a lane-dense [1, tm] row directly, no XLU transpose.
    logits = lax.dot_general(
        w3_ref[...], h,
        dimension_numbers=(((1,), (1,)), ((), ())),
        preferred_element_type=jnp.float32) + b3_ref[...]            # [1, tm]
    out_ref[...] = jax.nn.sigmoid(logits).astype(out_ref.dtype)


@functools.partial(jax.jit, static_argnames=("tm", "use_bf16"))
def link_predictor_dot(x_i, x_j, w1, b1, w2, b2, w3, b3, *,
                       tm=1024, use_bf16=True):
    """LinkPredictor (method='DOT') forward.

    Layouts: x_i/x_j [N, C]; w1 [C, H]; b1 [1, H]; w2 [H, H]; b2 [1, H];
    w3 [1, H] (the PyTorch last-layer weight as a row vector); b3 [1, 1].
    Returns [N, 1] float32 sigmoid probabilities.

    x_i/x_j are read at whatever dtype the caller supplies (pass bf16 to halve
    HBM traffic of this memory-bound kernel); `use_bf16` only controls the
    dtype fed to the two MXU GEMMs (weights + per-tile activation casts).
    """
    N, C = x_i.shape
    H = w1.shape[1]

    # ---- Tile-size selection -----------------------------------------------
    # Keep tm a multiple of 128 (lane-dense output blocks); don't make the
    # block larger than N rounded up to a lane.
    tm = max(128, min(_round_up(tm, 128), _round_up(N, 128)))
    # v7x (2 TensorCores/chip): aim for >= 4 grid steps per core so each core
    # still pipelines.  Single-core chips (v5e/v6e) keep tm large — extra grid
    # steps only add ~0.35 us apiece with no parallelism to gain.
    n_cores = _tensorcores_per_chip()
    if n_cores > 1:
        while tm > 256 and tm % 256 == 0 and pl.cdiv(N, tm) < 4 * n_cores:
            tm //= 2
    n_tiles = pl.cdiv(N, tm)

    # Weights are tiny (a few KiB) — casting them here is negligible and lets
    # the two real GEMMs run bf16 on the MXU; accumulation stays f32.
    cdt = jnp.bfloat16 if use_bf16 else jnp.float32
    w1c = w1.astype(cdt)
    w2c = w2.astype(cdt)

    row_spec = pl.BlockSpec((tm, C), lambda i: (i, 0))
    full = lambda shape: pl.BlockSpec(shape, lambda i: (0, 0))

    itemsize = lambda a: jnp.dtype(a.dtype).itemsize
    cost = pl.CostEstimate(
        flops=int(2 * N * (C * H + H * H + H)),
        transcendentals=int(N),  # sigmoid
        bytes_accessed=int(
            N * C * (itemsize(x_i) + itemsize(x_j)) + N * 4
            + sum(a.size * itemsize(a) for a in (w1c, b1, w2c, b2, w3, b3))),
    )

    out = pl.pallas_call(
        _link_predictor_kernel,
        out_shape=jax.ShapeDtypeStruct((1, N), jnp.float32),
        grid_spec=pltpu.PrefetchScalarGridSpec(
            num_scalar_prefetch=0,
            grid=(n_tiles,),
            in_specs=[
                row_spec, row_spec,
                full((C, H)), full((1, H)),
                full((H, H)), full((1, H)),
                full((1, H)), full((1, 1)),
            ],
            out_specs=pl.BlockSpec((1, tm), lambda i: (0, i)),
        ),
        compiler_params=pltpu.CompilerParams(
            dimension_semantics=("parallel",),
        ),
        cost_estimate=cost,
    )(x_i, x_j, w1c, b1, w2c, b2, w3, b3)

    return out.reshape(N, 1)


def _reference(x_i, x_j, w1, b1, w2, b2, w3, b3):
    # Row swap kept for fidelity to the PyTorch module (no-op for DOT).
    mask = x_i[:, -1:] < x_j[:, -1:]
    xi_s = jnp.where(mask, x_j, x_i)
    xj_s = jnp.where(mask, x_i, x_j)
    x = xi_s * xj_s
    h = jax.nn.relu(x @ w1 + b1)
    h = jax.nn.relu(h @ w2 + b2)
    return jax.nn.sigmoid(h @ w3.T + b3)


if __name__ == "__main__":
    # Module config: in_channels=32, hidden_channels=64, out_channels=1,
    # num_layers=3, dropout=0.5 (inference -> identity), method='DOT'.
    # N deliberately not a multiple of 128 to exercise the partial last block.
    N, C, H = 1000, 32, 64
    key = jax.random.PRNGKey(0)
    k = jax.random.split(key, 8)

    x_i = jax.random.normal(k[0], (N, C), jnp.float32)
    x_j = jax.random.normal(k[1], (N, C), jnp.float32)

    # Deterministic parameter init (stored already transposed: [in, out]).
    def init_linear(kw, kb, fan_in, fan_out):
        bound = 1.0 / jnp.sqrt(fan_in)
        w = jax.random.uniform(kw, (fan_in, fan_out), jnp.float32, -bound, bound)
        b = jax.random.uniform(kb, (1, fan_out), jnp.float32, -bound, bound)
        return w, b

    w1, b1 = init_linear(k[2], k[3], C, H)      # [C, H], [1, H]
    w2, b2 = init_linear(k[4], k[5], H, H)      # [H, H], [1, H]
    w3t, b3 = init_linear(k[6], k[7], H, 1)     # [H, 1], [1, 1]
    w3 = w3t.T                                  # [1, H] row vector

    ref = _reference(x_i, x_j, w1, b1, w2, b2, w3, b3)

    # 1) f32 path: exact-semantics check.
    out_f32 = link_predictor_dot(x_i, x_j, w1, b1, w2, b2, w3, b3,
                                 use_bf16=False)
    out_f32 = jax.block_until_ready(out_f32)
    assert out_f32.shape == (N, 1)
    assert jnp.allclose(out_f32, ref, atol=5e-3, rtol=0), "f32 mismatch vs reference"

    # 2) Default optimized path (bf16 MXU operands, f32 VPU math / accumulation).
    out_bf16 = link_predictor_dot(x_i, x_j, w1, b1, w2, b2, w3, b3)
    out_bf16 = jax.block_until_ready(out_bf16)
    assert out_bf16.shape == (N, 1)
    assert jnp.allclose(out_bf16, ref, atol=3e-2, rtol=0), "bf16 mismatch vs reference"

    print("KERNEL_OK")
</pallas_src>

<mosaic_0001>
module attributes {stable_mosaic.version = 11 : i64} {
  func.func @_link_predictor_kernel(%arg0: i32, %arg1: memref<1024x32xf32, #tpu.memory_space<vmem>>, %arg2: memref<1024x32xf32, #tpu.memory_space<vmem>>, %arg3: memref<32x64xf32, #tpu.memory_space<vmem>>, %arg4: memref<1x64xf32, #tpu.memory_space<vmem>>, %arg5: memref<64x64xf32, #tpu.memory_space<vmem>>, %arg6: memref<1x64xf32, #tpu.memory_space<vmem>>, %arg7: memref<1x64xf32, #tpu.memory_space<vmem>>, %arg8: memref<1x1xf32, #tpu.memory_space<vmem>>, %arg9: memref<1x1024xf32, #tpu.memory_space<vmem>>) attributes {dimension_semantics = [#tpu.dimension_semantics<parallel>], iteration_bounds = array<i64: 1>, scalar_prefetch = 0 : i64, scratch_operands = 0 : i64, tpu.core_type = #tpu.core_type<tc>, window_params = [{transform_indices = @transform_0, window_bounds = array<i64: 1024, 32>}, {transform_indices = @transform_1, window_bounds = array<i64: 1024, 32>}, {pipeline_mode = #tpu.pipeline_mode<synchronous>, transform_indices = @transform_2, window_bounds = array<i64: 32, 64>}, {pipeline_mode = #tpu.pipeline_mode<synchronous>, transform_indices = @transform_3, window_bounds = array<i64: 1, 64>}, {pipeline_mode = #tpu.pipeline_mode<synchronous>, transform_indices = @transform_4, window_bounds = array<i64: 64, 64>}, {pipeline_mode = #tpu.pipeline_mode<synchronous>, transform_indices = @transform_5, window_bounds = array<i64: 1, 64>}, {pipeline_mode = #tpu.pipeline_mode<synchronous>, transform_indices = @transform_6, window_bounds = array<i64: 1, 64>}, {pipeline_mode = #tpu.pipeline_mode<synchronous>, transform_indices = @transform_7, window_bounds = array<i64: 1, 1>}, {transform_indices = @transform_8, window_bounds = array<i64: 1, 1024>}]} {
    %c0 = arith.constant 0 : index
    %c0_0 = arith.constant 0 : index
    %0 = vector.load %arg1[%c0, %c0_0] : memref<1024x32xf32, #tpu.memory_space<vmem>>, vector<1024x32xf32>
    %c0_1 = arith.constant 0 : index
    %c0_2 = arith.constant 0 : index
    %1 = vector.load %arg2[%c0_1, %c0_2] : memref<1024x32xf32, #tpu.memory_space<vmem>>, vector<1024x32xf32>
    %2 = arith.mulf %0, %1 : vector<1024x32xf32>
    %c0_3 = arith.constant 0 : index
    %c0_4 = arith.constant 0 : index
    %3 = vector.load %arg3[%c0_3, %c0_4] : memref<32x64xf32, #tpu.memory_space<vmem>>, vector<32x64xf32>
    %cst = arith.constant dense<0.000000e+00> : vector<1024x64xf32>
    %4 = tpu.matmul %2, %3, %cst {dimension_numbers = #tpu.dot_dimension_numbers<[1], [0], [0], [1], [0, 0, 1, 1], [], []>} : vector<1024x32xf32>, vector<32x64xf32>, vector<1024x64xf32> -> vector<1024x64xf32>
    %c0_5 = arith.constant 0 : index
    %c0_6 = arith.constant 0 : index
    %5 = vector.load %arg4[%c0_5, %c0_6] : memref<1x64xf32, #tpu.memory_space<vmem>>, vector<1x64xf32>
    %6 = vector.broadcast %5 : vector<1x64xf32> to vector<1024x64xf32>
    %7 = arith.addf %4, %6 : vector<1024x64xf32>
    %cst_7 = arith.constant 0.000000e+00 : f32
    %8 = vector.broadcast %cst_7 : f32 to vector<1024x64xf32>
    %9 = arith.maximumf %7, %8 : vector<1024x64xf32>
    %c0_8 = arith.constant 0 : index
    %c0_9 = arith.constant 0 : index
    %10 = vector.load %arg5[%c0_8, %c0_9] : memref<64x64xf32, #tpu.memory_space<vmem>>, vector<64x64xf32>
    %cst_10 = arith.constant dense<0.000000e+00> : vector<1024x64xf32>
    %11 = tpu.matmul %9, %10, %cst_10 {dimension_numbers = #tpu.dot_dimension_numbers<[1], [0], [0], [1], [0, 0, 1, 1], [], []>} : vector<1024x64xf32>, vector<64x64xf32>, vector<1024x64xf32> -> vector<1024x64xf32>
    %c0_11 = arith.constant 0 : index
    %c0_12 = arith.constant 0 : index
    %12 = vector.load %arg6[%c0_11, %c0_12] : memref<1x64xf32, #tpu.memory_space<vmem>>, vector<1x64xf32>
    %13 = vector.broadcast %12 : vector<1x64xf32> to vector<1024x64xf32>
    %14 = arith.addf %11, %13 : vector<1024x64xf32>
    %cst_13 = arith.constant 0.000000e+00 : f32
    %15 = vector.broadcast %cst_13 : f32 to vector<1024x64xf32>
    %16 = arith.maximumf %14, %15 : vector<1024x64xf32>
    %c0_14 = arith.constant 0 : index
    %c0_15 = arith.constant 0 : index
    %17 = vector.load %arg7[%c0_14, %c0_15] : memref<1x64xf32, #tpu.memory_space<vmem>>, vector<1x64xf32>
    %cst_16 = arith.constant dense<0.000000e+00> : vector<1x1024xf32>
    %18 = tpu.matmul %17, %16, %cst_16 {dimension_numbers = #tpu.dot_dimension_numbers<[1], [1], [0], [0], [0, 0, 1, 0], [], []>} : vector<1x64xf32>, vector<1024x64xf32>, vector<1x1024xf32> -> vector<1x1024xf32>
    %c0_17 = arith.constant 0 : index
    %c0_18 = arith.constant 0 : index
    %19 = vector.load %arg8[%c0_17, %c0_18] : memref<1x1xf32, #tpu.memory_space<vmem>>, vector<1x1xf32>
    %20 = vector.broadcast %19 : vector<1x1xf32> to vector<1x1024xf32>
    %21 = arith.addf %18, %20 : vector<1x1024xf32>
    %22 = arith.negf %21 : vector<1x1024xf32>
    %23 = math.exp %22 : vector<1x1024xf32>
    %cst_19 = arith.constant 1.000000e+00 : f32
    %24 = vector.broadcast %cst_19 : f32 to vector<1x1024xf32>
    %25 = arith.addf %24, %23 : vector<1x1024xf32>
    %26 = arith.divf %24, %25 : vector<1x1024xf32>
    %c0_20 = arith.constant 0 : index
    %c0_21 = arith.constant 0 : index
    %27 = vector.load %arg9[%c0_20, %c0_21] : memref<1x1024xf32, #tpu.memory_space<vmem>>, vector<1x1024xf32>
    tpu.vector_store %arg9[%c0_20, %c0_21], %26 {strides = array<i32>} : memref<1x1024xf32, #tpu.memory_space<vmem>>, vector<1x1024xf32>,
    return
  }
  func.func @transform_0(%arg0: i32) -> (i32, i32) {
    %c0_i32 = arith.constant 0 : i32
    %c0_i32_0 = arith.constant 0 : i32
    return %arg0, %c0_i32 : i32, i32
  }
  func.func @transform_1(%arg0: i32) -> (i32, i32) {
    %c0_i32 = arith.constant 0 : i32
    %c0_i32_0 = arith.constant 0 : i32
    return %arg0, %c0_i32 : i32, i32
  }
  func.func @transform_2(%arg0: i32) -> (i32, i32) {
    %c0_i32 = arith.constant 0 : i32
    %c0_i32_0 = arith.constant 0 : i32
    %c0_i32_1 = arith.constant 0 : i32
    return %c0_i32, %c0_i32_0 : i32, i32
  }
  func.func @transform_3(%arg0: i32) -> (i32, i32) {
    %c0_i32 = arith.constant 0 : i32
    %c0_i32_0 = arith.constant 0 : i32
    %c0_i32_1 = arith.constant 0 : i32
    return %c0_i32, %c0_i32_0 : i32, i32
  }
  func.func @transform_4(%arg0: i32) -> (i32, i32) {
    %c0_i32 = arith.constant 0 : i32
    %c0_i32_0 = arith.constant 0 : i32
    %c0_i32_1 = arith.constant 0 : i32
    return %c0_i32, %c0_i32_0 : i32, i32
  }
  func.func @transform_5(%arg0: i32) -> (i32, i32) {
    %c0_i32 = arith.constant 0 : i32
    %c0_i32_0 = arith.constant 0 : i32
    %c0_i32_1 = arith.constant 0 : i32
    return %c0_i32, %c0_i32_0 : i32, i32
  }
  func.func @transform_6(%arg0: i32) -> (i32, i32) {
    %c0_i32 = arith.constant 0 : i32
    %c0_i32_0 = arith.constant 0 : i32
    %c0_i32_1 = arith.constant 0 : i32
    return %c0_i32, %c0_i32_0 : i32, i32
  }
  func.func @transform_7(%arg0: i32) -> (i32, i32) {
    %c0_i32 = arith.constant 0 : i32
    %c0_i32_0 = arith.constant 0 : i32
    %c0_i32_1 = arith.constant 0 : i32
    return %c0_i32, %c0_i32_0 : i32, i32
  }
  func.func @transform_8(%arg0: i32) -> (i32, i32) {
    %c0_i32 = arith.constant 0 : i32
    %c0_i32_0 = arith.constant 0 : i32
    return %c0_i32, %arg0 : i32, i32
  }
}

</mosaic_0001>

<bundles_post_ra>
// kernel: link_predictor_dot.1
= control target key start
LH: loop header
LB: loop body
LE: loop exit
PB: predicated region body
PF: predicated region fallthrough
CT: control target
= control target key end

     0   :  { %s6819_s0 = inlined_call_operand.vmem [shape: f32[1000,32], index: 0, kind: input, shape index: {}]   ;;  %s6820_s1 = inlined_call_operand.vmem [shape: f32[1000,32], index: 1, kind: input, shape index: {}]   ;;  %s6821_s2 = inlined_call_operand.vmem [shape: f32[32,64], index: 2, kind: input, shape index: {}]   ;;  %s6822_s3 = inlined_call_operand.vmem [shape: f32[1,64], index: 3, kind: input, shape index: {}]   ;;  %s6823_s4 = inlined_call_operand.vmem [shape: f32[64,64], index: 4, kind: input, shape index: {}]   ;;  %s6824_s5 = inlined_call_operand.vmem [shape: f32[1,64], index: 5, kind: input, shape index: {}]   ;;  %s6825_s6 = inlined_call_operand.vmem [shape: f32[1,64], index: 6, kind: input, shape index: {}]   ;;  %s6826_s7 = inlined_call_operand.<no memory space> [shape: f32[1,1], index: 7, kind: input, shape index: {}]   ;;  %s6827_s8 = inlined_call_operand.hbm [shape: f32[1,1000], index: 8, kind: output, shape index: {}]  }
   0x1   :  { %v13_v0 = vstv %s6826_s7 }
   0x2   :  { %14 = vst [vmem:[#allocation2] sm:$0x1] %v13_v0 }
   0x3   :  { %v416_v1 = vld [vmem:[%s6821_s2] sm:$0xff]  ;;  %v417_v2 = vld [vmem:[%s6821_s2 + $0x8] sm:$0xff]  ;;  %v418_v3 = vld [vmem:[%s6821_s2 + $0x10] sm:$0xff]  ;;  %vm427_vm0 = vcmask 261120  }
   0x4   :  { %v4891_v4 = vpack.c.bf16 %v417_v2, %v416_v1  ;;  %v419_v5 = vld [vmem:[%s6821_s2 + $0x18] sm:$0xff]  ;;  %v32_v6 = vld [vmem:[%s6819_s0] sm:$0xff]  ;;  %v33_v10 = vld [vmem:[%s6819_s0 + $0x8] sm:$0xff] }
   0x5   :  { %v160_v7 = vld [vmem:[%s6820_s1] sm:$0xff]  ;;  %v4895_v8 = vpack.c.bf16 %v419_v5, %v418_v3  ;;  %v161_v11 = vld [vmem:[%s6820_s1 + $0x8] sm:$0xff]  ;;  %v34_v12 = vld [vmem:[%s6819_s0 + $0x10] sm:$0xff] }
   0x6   :  { %v288_v9 = vmul.f32 %v160_v7, %v32_v6  ;;  %4892 = vmatprep.subr.bf16.mxu0 %v4891_v4  ;;  %v162_v13 = vld [vmem:[%s6820_s1 + $0x10] sm:$0xff]  ;;  %v289_v14 = vmul.f32 %v161_v11, %v33_v10  ;;  %v35_v16 = vld [vmem:[%s6819_s0 + $0x18] sm:$0xff]  ;;  %v36_v18 = vld [vmem:[%s6819_s0 + $0x20] sm:$0xff] }
   0x7   :  { %4894 = vmatpush3.bf16.msra.mxu0 %v4891_v4  ;;  %v290_v15 = vmul.f32 %v162_v13, %v34_v12  ;;  %v163_v17 = vld [vmem:[%s6820_s1 + $0x18] sm:$0xff]  ;;  %v164_v19 = vld [vmem:[%s6820_s1 + $0x20] sm:$0xff]  ;;  %v37_v22 = vld [vmem:[%s6819_s0 + $0x28] sm:$0xff] }
   0x8   :  { %4491 = vmatprep.mubr.msk.f32.mxu0 %vm427_vm0, %v288_v9  ;;  %4896 = vmatprep.subr.bf16.mxu0 %v4895_v8  ;;  %v291_v20 = vmul.f32 %v163_v17, %v35_v16  ;;  %v292_v21 = vmul.f32 %v164_v19, %v36_v18  ;;  %v165_v23 = vld [vmem:[%s6820_s1 + $0x28] sm:$0xff]  ;;  %v38_v24 = vld [vmem:[%s6819_s0 + $0x30] sm:$0xff]  ;;  %v39_v28 = vld [vmem:[%s6819_s0 + $0x38] sm:$0xff] }
   0x9   :  { %v166_v25 = vld [vmem:[%s6820_s1 + $0x30] sm:$0xff]  ;;  %v293_v26 = vmul.f32 %v165_v23, %v37_v22  ;;  %v167_v29 = vld [vmem:[%s6820_s1 + $0x38] sm:$0xff]  ;;  %v40_v30 = vld [vmem:[%s6819_s0 + $0x40] sm:$0xff] }
   0xa   :  { %v294_v27 = vmul.f32 %v166_v25, %v38_v24  ;;  %v168_v31 = vld [vmem:[%s6820_s1 + $0x40] sm:$0xff]  ;;  %v295_v32 = vmul.f32 %v167_v29, %v39_v28  ;;  %v41_v34 = vld [vmem:[%s6819_s0 + $0x48] sm:$0xff]  ;;  %v42_v36 = vld [vmem:[%s6819_s0 + $0x50] sm:$0xff] }
   0xb   :  { %4898 = vmatpush3.bf16.msra.mxu0 %v4895_v8  ;;  %v296_v33 = vmul.f32 %v168_v31, %v40_v30  ;;  %v169_v35 = vld [vmem:[%s6820_s1 + $0x48] sm:$0xff]  ;;  %v170_v37 = vld [vmem:[%s6820_s1 + $0x50] sm:$0xff]  ;;  %v43_v40 = vld [vmem:[%s6819_s0 + $0x58] sm:$0xff] }
   0xc   :  { %v297_v38 = vmul.f32 %v169_v35, %v41_v34  ;;  %v298_v39 = vmul.f32 %v170_v37, %v42_v36  ;;  %v171_v41 = vld [vmem:[%s6820_s1 + $0x58] sm:$0xff]  ;;  %v44_v42 = vld [vmem:[%s6819_s0 + $0x60] sm:$0xff]  ;;  %v45_v46 = vld [vmem:[%s6819_s0 + $0x68] sm:$0xff] }
   0xd   :  { %v172_v43 = vld [vmem:[%s6820_s1 + $0x60] sm:$0xff]  ;;  %v299_v44 = vmul.f32 %v171_v41, %v43_v40  ;;  %v173_v47 = vld [vmem:[%s6820_s1 + $0x68] sm:$0xff]  ;;  %v46_v48 = vld [vmem:[%s6819_s0 + $0x70] sm:$0xff] }
   0xe   :  { %4492 = vmatmul.mubr.msk.f32.vlgmr.msra.gmra.mrb[0].mxu0 %vm427_vm0, %v289_v14  ;;  %v300_v45 = vmul.f32 %v172_v43, %v44_v42  ;;  %v174_v49 = vld [vmem:[%s6820_s1 + $0x70] sm:$0xff]  ;;  %v301_v50 = vmul.f32 %v173_v47, %v45_v46  ;;  %v47_v52 = vld [vmem:[%s6819_s0 + $0x78] sm:$0xff]  ;;  %v48_v54 = vld [vmem:[%s6819_s0 + $0x80] sm:$0xff] }
   0xf   :  { %4494 = vmatprep.mubr.msk.f32.mxu0 %vm427_vm0, %v290_v15  ;;  %v302_v51 = vmul.f32 %v174_v49, %v46_v48  ;;  %v175_v53 = vld [vmem:[%s6820_s1 + $0x78] sm:$0xff]  ;;  %v176_v55 = vld [vmem:[%s6820_s1 + $0x80] sm:$0xff]  ;;  %v49_v58 = vld [vmem:[%s6819_s0 + $0x88] sm:$0xff] }
  0x10   :  { %v303_v56 = vmul.f32 %v175_v53, %v47_v52  ;;  %v304_v57 = vmul.f32 %v176_v55, %v48_v54  ;;  %v177_v59 = vld [vmem:[%s6820_s1 + $0x88] sm:$0xff]  ;;  %v50_v60 = vld [vmem:[%s6819_s0 + $0x90] sm:$0xff]  ;;  %v51_v0 = vld [vmem:[%s6819_s0 + $0x98] sm:$0xff] }
  0x11   :  { %v178_v61 = vld [vmem:[%s6820_s1 + $0x90] sm:$0xff]  ;;  %v305_v62 = vmul.f32 %v177_v59, %v49_v58  ;;  %v179_v1 = vld [vmem:[%s6820_s1 + $0x98] sm:$0xff]  ;;  %v52_v2 = vld [vmem:[%s6819_s0 + $0xa0] sm:$0xff] }
  0x12   :  { %4495 = vmatmul.mubr.msk.f32.gmra.mrb[2].mxu0 %vm427_vm0, %v291_v20  ;;  %v306_v63 = vmul.f32 %v178_v61, %v50_v60  ;;  %v180_v3 = vld [vmem:[%s6820_s1 + $0xa0] sm:$0xff]  ;;  %v307_v4 = vmul.f32 %v179_v1, %v51_v0  ;;  %v53_v6 = vld [vmem:[%s6819_s0 + $0xa8] sm:$0xff]  ;;  %v54_v8 = vld [vmem:[%s6819_s0 + $0xb0] sm:$0xff] }
  0x13   :  { %4497 = vmatprep.mubr.msk.f32.mxu0 %vm427_vm0, %v292_v21  ;;  %v308_v5 = vmul.f32 %v180_v3, %v52_v2  ;;  %v181_v7 = vld [vmem:[%s6820_s1 + $0xa8] sm:$0xff]  ;;  %v182_v9 = vld [vmem:[%s6820_s1 + $0xb0] sm:$0xff]  ;;  %v55_v11 = vld [vmem:[%s6819_s0 + $0xb8] sm:$0xff] }
  0x14   :  { %v309_v10 = vmul.f32 %v181_v7, %v53_v6  ;;  %v310_v12 = vmul.f32 %v182_v9, %v54_v8  ;;  %v183_v13 = vld [vmem:[%s6820_s1 + $0xb8] sm:$0xff]  ;;  %v1645_v14 = vld [vmem:[%s6823_s4] sm:$0xff]  ;;  %v1646_v15 = vld [vmem:[%s6823_s4 + $0x8] sm:$0xff] }
  0x15   :  { %v56_v16 = vld [vmem:[%s6819_s0 + $0xc0] sm:$0xff]  ;;  %v4899_v18 = vpack.c.bf16 %v1646_v15, %v1645_v14  ;;  %v1647_v19 = vld [vmem:[%s6823_s4 + $0x10] sm:$0xff]  ;;  %v1648_v20 = vld [vmem:[%s6823_s4 + $0x18] sm:$0xff]  ;;  %v311_v21 = vmul.f32 %v183_v13, %v55_v11 }
  0x16   :  { %4498 = vmatmul.mubr.msk.f32.gmra.mrb[4].mxu0 %vm427_vm0, %v293_v26  ;;  %v184_v17 = vld [vmem:[%s6820_s1 + $0xc0] sm:$0xff]  ;;  %v57_v22 = vld [vmem:[%s6819_s0 + $0xc8] sm:$0xff]  ;;  %v4903_v23 = vpack.c.bf16 %v1648_v20, %v1647_v19  ;;  %v58_v28 = vld [vmem:[%s6819_s0 + $0xd0] sm:$0xff] }
  0x17   :  { %4500 = vmatprep.mubr.msk.f32.mxu0 %vm427_vm0, %v294_v27  ;;  %4900 = vmatprep.subr.bf16.mxu1 %v4899_v18  ;;  %v312_v24 = vmul.f32 %v184_v17, %v56_v16  ;;  %v185_v25 = vld [vmem:[%s6820_s1 + $0xc8] sm:$0xff]  ;;  %v1649_v26 = vld [vmem:[%s6823_s4 + $0x20] sm:$0xff]  ;;  %v186_v29 = vld [vmem:[%s6820_s1 + $0xd0] sm:$0xff] }
  0x18   :  { %4902 = vmatpush3.bf16.msra.mxu1 %v4899_v18  ;;  %v1650_v27 = vld [vmem:[%s6823_s4 + $0x28] sm:$0xff]  ;;  %v313_v31 = vmul.f32 %v185_v25, %v57_v22  ;;  %v187_v34 = vld [vmem:[%s6820_s1 + $0xd8] sm:$0xff]  ;;  %v60_v35 = vld [vmem:[%s6819_s0 + $0xe0] sm:$0xff] }
  0x19   :  { %4904 = vmatprep.subr.bf16.mxu1 %v4903_v23  ;;  %v4907_v30 = vpack.c.bf16 %v1650_v27, %v1649_v26  ;;  %v188_v36 = vld [vmem:[%s6820_s1 + $0xe0] sm:$0xff]  ;;  %v189_v40 = vld [vmem:[%s6820_s1 + $0xe8] sm:$0xff]  ;;  %v62_v41 = vld [vmem:[%s6819_s0 + $0xf0] sm:$0xff] }
  0x1a   :  { %4501 = vmatmul.mubr.msk.f32.gmra.mrb[6].mxu0 %vm427_vm0, %v295_v32  ;;  %v314_v32 = vmul.f32 %v186_v29, %v58_v28  ;;  %v190_v42 = vld [vmem:[%s6820_s1 + $0xf0] sm:$0xff]  ;;  %v191_v46 = vld [vmem:[%s6820_s1 + $0xf8] sm:$0xff]  ;;  %v64_v47 = vld [vmem:[%s6819_s0 + $0x100] sm:$0xff] }
  0x1b   :  { %4503 = vmatprep.mubr.msk.f32.mxu0 %vm427_vm0, %v296_v33  ;;  %v59_v33 = vld [vmem:[%s6819_s0 + $0xd8] sm:$0xff]  ;;  %v192_v48 = vld [vmem:[%s6820_s1 + $0x100] sm:$0xff] }
  0x1c   :  { %4906 = vmatpush3.bf16.msra.mxu1 %v4903_v23  ;;  %v315_v37 = vmul.f32 %v187_v34, %v59_v33 }
  0x1d   :  { %4908 = vmatprep.subr.bf16.mxu1 %v4907_v30 }
  0x1e   :  { %4504 = vmatmul.mubr.msk.f32.gmra.mrb[8].mxu0 %vm427_vm0, %v297_v38  ;;  %v316_v38 = vmul.f32 %v188_v36, %v60_v35 }
  0x1f   :  { %4506 = vmatprep.mubr.msk.f32.mxu0 %vm427_vm0, %v298_v39  ;;  %v61_v39 = vld [vmem:[%s6819_s0 + $0xe8] sm:$0xff] }
  0x20   :  { %4910 = vmatpush3.bf16.msra.mxu1 %v4907_v30  ;;  %v317_v43 = vmul.f32 %v189_v40, %v61_v39 }
  0x22   :  { %4507 = vmatmul.mubr.msk.f32.gmra.mrb[10].mxu0 %vm427_vm0, %v299_v44  ;;  %v318_v44 = vmul.f32 %v190_v42, %v62_v41 }
  0x23   :  { %4509 = vmatprep.mubr.msk.f32.mxu0 %vm427_vm0, %v300_v45  ;;  %v63_v45 = vld [vmem:[%s6819_s0 + $0xf8] sm:$0xff] }
  0x26   :  { %4510 = vmatmul.mubr.msk.f32.gmra.mrb[12].mxu0 %vm427_vm0, %v301_v50 }
  0x27   :  { %4512 = vmatprep.mubr.msk.f32.mxu0 %vm427_vm0, %v302_v51 }
  0x2a   :  { %4513 = vmatmul.mubr.msk.f32.gmra.mrb[14].mxu0 %vm427_vm0, %v303_v56 }
  0x2b   :  { %4515 = vmatprep.mubr.msk.f32.mxu0 %vm427_vm0, %v304_v57 }
  0x2e   :  { %4516 = vmatmul.mubr.msk.f32.gmra.mrb[16].mxu0 %vm427_vm0, %v305_v62 }
  0x2f   :  { %4518 = vmatprep.mubr.msk.f32.mxu0 %vm427_vm0, %v306_v63 }
  0x32   :  { %4519 = vmatmul.mubr.msk.f32.gmra.mrb[18].mxu0 %vm427_vm0, %v307_v4 }
  0x33   :  { %4521 = vmatprep.mubr.msk.f32.mxu0 %vm427_vm0, %v308_v5 }
  0x36   :  { %4522 = vmatmul.mubr.msk.f32.gmra.mrb[20].mxu0 %vm427_vm0, %v309_v10 }
  0x37   :  { %4524 = vmatprep.mubr.msk.f32.mxu0 %vm427_vm0, %v310_v12 }
  0x3a   :  { %4525 = vmatmul.mubr.msk.f32.gmra.mrb[22].mxu0 %vm427_vm0, %v311_v21 }
  0x3b   :  { %4527 = vmatprep.mubr.msk.f32.mxu0 %vm427_vm0, %v312_v24 }
  0x3e   :  { %4528 = vmatmul.mubr.msk.f32.gmra.mrb[24].mxu0 %vm427_vm0, %v313_v31 }
  0x3f   :  { %4530 = vmatprep.mubr.msk.f32.mxu0 %vm427_vm0, %v314_v32 }
  0x42   :  { %4531 = vmatmul.mubr.msk.f32.gmra.mrb[26].mxu0 %vm427_vm0, %v315_v37 }
  0x43   :  { %4533 = vmatprep.mubr.msk.f32.mxu0 %vm427_vm0, %v316_v38 }
  0x44   :  { %15 = vsyncpa [#allocation4], 0  ;;  %v319_v49 = vmul.f32 %v191_v46, %v63_v45  ;;  %v320_v50 = vmul.f32 %v192_v48, %v64_v47  ;;  %v65_v51 = vld [vmem:[%s6819_s0 + $0x108] sm:$0xff]  ;;  %v66_v53 = vld [vmem:[%s6819_s0 + $0x110] sm:$0xff]  ;;  %vm1660_vm1 = vcmask 523264  }
  0x45   :  { %v193_v52 = vld [vmem:[%s6820_s1 + $0x108] sm:$0xff]  ;;  %v194_v54 = vld [vmem:[%s6820_s1 + $0x110] sm:$0xff]  ;;  %v67_v57 = vld [vmem:[%s6819_s0 + $0x118] sm:$0xff] }
  0x46   :  { %4534 = vmatmul.mubr.msk.f32.gmra.mrb[28].mxu0 %vm427_vm0, %v317_v43  ;;  %v321_v55 = vmul.f32 %v193_v52, %v65_v51  ;;  %v322_v56 = vmul.f32 %v194_v54, %v66_v53  ;;  %v195_v58 = vld [vmem:[%s6820_s1 + $0x118] sm:$0xff]  ;;  %v68_v59 = vld [vmem:[%s6819_s0 + $0x120] sm:$0xff]  ;;  %v69_v63 = vld [vmem:[%s6819_s0 + $0x128] sm:$0xff] }
  0x47   :  { %4536 = vmatprep.mubr.msk.f32.mxu0 %vm427_vm0, %v318_v44  ;;  %v196_v60 = vld [vmem:[%s6820_s1 + $0x120] sm:$0xff]  ;;  %v323_v61 = vmul.f32 %v195_v58, %v67_v57  ;;  %v197_v0 = vld [vmem:[%s6820_s1 + $0x128] sm:$0xff]  ;;  %v70_v1 = vld [vmem:[%s6819_s0 + $0x130] sm:$0xff] }
  0x48   :  { %v324_v62 = vmul.f32 %v196_v60, %v68_v59  ;;  %v198_v2 = vld [vmem:[%s6820_s1 + $0x130] sm:$0xff]  ;;  %v325_v3 = vmul.f32 %v197_v0, %v69_v63  ;;  %v71_v5 = vld [vmem:[%s6819_s0 + $0x138] sm:$0xff]  ;;  %v72_v7 = vld [vmem:[%s6819_s0 + $0x140] sm:$0xff] }
  0x49   :  { %v326_v4 = vmul.f32 %v198_v2, %v70_v1  ;;  %v199_v6 = vld [vmem:[%s6820_s1 + $0x138] sm:$0xff]  ;;  %v200_v8 = vld [vmem:[%s6820_s1 + $0x140] sm:$0xff]  ;;  %v73_v11 = vld [vmem:[%s6819_s0 + $0x148] sm:$0xff] }
  0x4a   :  { %4537 = vmatmul.mubr.msk.f32.gmra.mrb[30].mxu0 %vm427_vm0, %v319_v49  ;;  %v327_v9 = vmul.f32 %v199_v6, %v71_v5  ;;  %v328_v10 = vmul.f32 %v200_v8, %v72_v7  ;;  %v201_v12 = vld [vmem:[%s6820_s1 + $0x148] sm:$0xff]  ;;  %v74_v13 = vld [vmem:[%s6819_s0 + $0x150] sm:$0xff]  ;;  %v75_v17 = vld [vmem:[%s6819_s0 + $0x158] sm:$0xff] }
  0x4b   :  { %4539 = vmatprep.mubr.msk.f32.mxu0 %vm427_vm0, %v320_v50  ;;  %v202_v14 = vld [vmem:[%s6820_s1 + $0x150] sm:$0xff]  ;;  %v329_v15 = vmul.f32 %v201_v12, %v73_v11  ;;  %v203_v18 = vld [vmem:[%s6820_s1 + $0x158] sm:$0xff]  ;;  %v76_v19 = vld [vmem:[%s6819_s0 + $0x160] sm:$0xff] }
  0x4c   :  { %v330_v16 = vmul.f32 %v202_v14, %v74_v13  ;;  %v204_v20 = vld [vmem:[%s6820_s1 + $0x160] sm:$0xff]  ;;  %v331_v21 = vmul.f32 %v203_v18, %v75_v17  ;;  %v77_v23 = vld [vmem:[%s6819_s0 + $0x168] sm:$0xff]  ;;  %v78_v25 = vld [vmem:[%s6819_s0 + $0x170] sm:$0xff] }
  0x4d   :  { %v332_v22 = vmul.f32 %v204_v20, %v76_v19  ;;  %v205_v24 = vld [vmem:[%s6820_s1 + $0x168] sm:$0xff]  ;;  %v206_v26 = vld [vmem:[%s6820_s1 + $0x170] sm:$0xff]  ;;  %v1652_v28 = vld [vmem:[%s6823_s4 + $0x38] sm:$0xff] }
  0x4e   :  { %4540 = vmatmul.mubr.msk.f32.gmra.mrb[32].mxu0 %vm427_vm0, %v321_v55  ;;  %v1651_v27 = vld [vmem:[%s6823_s4 + $0x30] sm:$0xff]  ;;  %v333_v29 = vmul.f32 %v205_v24, %v77_v23  ;;  %v334_v31 = vmul.f32 %v206_v26, %v78_v25  ;;  %v79_v32 = vld [vmem:[%s6819_s0 + $0x178] sm:$0xff]  ;;  %v80_v34 = vld [vmem:[%s6819_s0 + $0x180] sm:$0xff] }
  0x4f   :  { %4542 = vmatprep.mubr.msk.f32.mxu0 %vm427_vm0, %v322_v56  ;;  %v4911_v30 = vpack.c.bf16 %v1652_v28, %v1651_v27  ;;  %v207_v33 = vld [vmem:[%s6820_s1 + $0x178] sm:$0xff]  ;;  %v208_v35 = vld [vmem:[%s6820_s1 + $0x180] sm:$0xff]  ;;  %v81_v38 = vld [vmem:[%s6819_s0 + $0x188] sm:$0xff] }
  0x50   :  { %v335_v36 = vmul.f32 %v207_v33, %v79_v32  ;;  %v336_v37 = vmul.f32 %v208_v35, %v80_v34  ;;  %v209_v39 = vld [vmem:[%s6820_s1 + $0x188] sm:$0xff]  ;;  %v82_v40 = vld [vmem:[%s6819_s0 + $0x190] sm:$0xff]  ;;  %v83_v44 = vld [vmem:[%s6819_s0 + $0x198] sm:$0xff] }
  0x51   :  { %4912 = vmatprep.subr.bf16.mxu1 %v4911_v30  ;;  %v210_v41 = vld [vmem:[%s6820_s1 + $0x190] sm:$0xff]  ;;  %v337_v42 = vmul.f32 %v209_v39, %v81_v38  ;;  %v211_v45 = vld [vmem:[%s6820_s1 + $0x198] sm:$0xff]  ;;  %v84_v46 = vld [vmem:[%s6819_s0 + $0x1a0] sm:$0xff] }
  0x52   :  { %4543 = vmatmul.mubr.msk.f32.gmra.mrb[34].mxu0 %vm427_vm0, %v323_v61  ;;  %4914 = vmatpush3.bf16.msra.mxu1 %v4911_v30  ;;  %v338_v43 = vmul.f32 %v210_v41, %v82_v40  ;;  %v212_v47 = vld [vmem:[%s6820_s1 + $0x1a0] sm:$0xff]  ;;  %v339_v48 = vmul.f32 %v211_v45, %v83_v44  ;;  %v85_v50 = vld [vmem:[%s6819_s0 + $0x1a8] sm:$0xff]  ;;  %v86_v52 = vld [vmem:[%s6819_s0 + $0x1b0] sm:$0xff] }
  0x53   :  { %4545 = vmatprep.mubr.msk.f32.mxu0 %vm427_vm0, %v324_v62  ;;  %v340_v49 = vmul.f32 %v212_v47, %v84_v46  ;;  %v213_v51 = vld [vmem:[%s6820_s1 + $0x1a8] sm:$0xff]  ;;  %v214_v53 = vld [vmem:[%s6820_s1 + $0x1b0] sm:$0xff]  ;;  %v87_v56 = vld [vmem:[%s6819_s0 + $0x1b8] sm:$0xff] }
  0x54   :  { %v341_v54 = vmul.f32 %v213_v51, %v85_v50  ;;  %v342_v55 = vmul.f32 %v214_v53, %v86_v52  ;;  %v215_v57 = vld [vmem:[%s6820_s1 + $0x1b8] sm:$0xff]  ;;  %v88_v58 = vld [vmem:[%s6819_s0 + $0x1c0] sm:$0xff]  ;;  %v89_v62 = vld [vmem:[%s6819_s0 + $0x1c8] sm:$0xff] }
  0x55   :  { %v216_v59 = vld [vmem:[%s6820_s1 + $0x1c0] sm:$0xff]  ;;  %v343_v60 = vmul.f32 %v215_v57, %v87_v56  ;;  %v217_v63 = vld [vmem:[%s6820_s1 + $0x1c8] sm:$0xff]  ;;  %v90_v0 = vld [vmem:[%s6819_s0 + $0x1d0] sm:$0xff] }
  0x56   :  { %4546 = vmatmul.mubr.msk.f32.gmra.mrb[36].mxu0 %vm427_vm0, %v325_v3  ;;  %v344_v61 = vmul.f32 %v216_v59, %v88_v58  ;;  %v218_v1 = vld [vmem:[%s6820_s1 + $0x1d0] sm:$0xff]  ;;  %v345_v2 = vmul.f32 %v217_v63, %v89_v62  ;;  %v219_v5 = vld [vmem:[%s6820_s1 + $0x1d8] sm:$0xff]  ;;  %v92_v6 = vld [vmem:[%s6819_s0 + $0x1e0] sm:$0xff] }
  0x57   :  { %4548 = vmatprep.mubr.msk.f32.mxu0 %vm427_vm0, %v326_v4  ;;  %v346_v3 = vmul.f32 %v218_v1, %v90_v0  ;;  %v91_v4 = vld [vmem:[%s6819_s0 + $0x1d8] sm:$0xff]  ;;  %v220_v7 = vld [vmem:[%s6820_s1 + $0x1e0] sm:$0xff]  ;;  %v221_v11 = vld [vmem:[%s6820_s1 + $0x1e8] sm:$0xff] }
  0x58   :  { %v347_v8 = vmul.f32 %v219_v5, %v91_v4  ;;  %v94_v12 = vld [vmem:[%s6819_s0 + $0x1f0] sm:$0xff]  ;;  %v223_v17 = vld [vmem:[%s6820_s1 + $0x1f8] sm:$0xff]  ;;  %v96_v18 = vld [vmem:[%s6819_s0 + $0x200] sm:$0xff] }
  0x59   :  { %v222_v13 = vld [vmem:[%s6820_s1 + $0x1f0] sm:$0xff]  ;;  %v224_v19 = vld [vmem:[%s6820_s1 + $0x200] sm:$0xff]  ;;  %v225_v23 = vld [vmem:[%s6820_s1 + $0x208] sm:$0xff] }
  0x5a   :  { %4549 = vmatmul.mubr.msk.f32.gmra.mrb[38].mxu0 %vm427_vm0, %v327_v9  ;;  %v348_v9 = vmul.f32 %v220_v7, %v92_v6  ;;  %v98_v24 = vld [vmem:[%s6819_s0 + $0x210] sm:$0xff]  ;;  %v99_v28 = vld [vmem:[%s6819_s0 + $0x218] sm:$0xff]  ;;  %v100_v30 = vld [vmem:[%s6819_s0 + $0x220] sm:$0xff] }
  0x5b   :  { %4551 = vmatprep.mubr.msk.f32.mxu0 %vm427_vm0, %v328_v10  ;;  %v93_v10 = vld [vmem:[%s6819_s0 + $0x1e8] sm:$0xff]  ;;  %v226_v25 = vld [vmem:[%s6820_s1 + $0x210] sm:$0xff]  ;;  %v103_v40 = vld [vmem:[%s6819_s0 + $0x238] sm:$0xff] }
  0x5c   :  { %v349_v14 = vmul.f32 %v221_v11, %v93_v10  ;;  %v354_v27 = vmul.f32 %v226_v25, %v98_v24  ;;  %v101_v34 = vld [vmem:[%s6819_s0 + $0x228] sm:$0xff]  ;;  %v231_v41 = vld [vmem:[%s6820_s1 + $0x238] sm:$0xff]  ;;  %vm6457_vm2 = vmpackc.low %vm1660_vm1, %vm1660_vm1 }
  0x5d   :  { %v229_v35 = vld [vmem:[%s6820_s1 + $0x228] sm:$0xff]  ;;  %v359_v44 = vmul.f32 %v231_v41, %v103_v40  ;;  %v107_v52 = vld [vmem:[%s6819_s0 + $0x258] sm:$0xff] }
  0x5e   :  { %4552 = vmatmul.mubr.msk.f32.gmra.mrb[40].mxu0 %vm427_vm0, %v329_v15  ;;  %v350_v15 = vmul.f32 %v222_v13, %v94_v12  ;;  %v357_v38 = vmul.f32 %v229_v35, %v101_v34  ;;  %v105_v46 = vld [vmem:[%s6819_s0 + $0x248] sm:$0xff]  ;;  %v235_v53 = vld [vmem:[%s6820_s1 + $0x258] sm:$0xff] }
  0x5f   :  { %4554 = vmatprep.mubr.msk.f32.mxu0 %vm427_vm0, %v330_v16  ;;  %v95_v16 = vld [vmem:[%s6819_s0 + $0x1f8] sm:$0xff]  ;;  %v233_v47 = vld [vmem:[%s6820_s1 + $0x248] sm:$0xff]  ;;  %v363_v56 = vmul.f32 %v235_v53, %v107_v52 }
  0x60   :  { %v351_v20 = vmul.f32 %v223_v17, %v95_v16  ;;  %v361_v50 = vmul.f32 %v233_v47, %v105_v46  ;;  %v109_v58 = vld [vmem:[%s6819_s0 + $0x268] sm:$0xff]  ;;  %v111_v0 = vld [vmem:[%s6819_s0 + $0x278] sm:$0xff] }
  0x61   :  { %v237_v59 = vld [vmem:[%s6820_s1 + $0x268] sm:$0xff]  ;;  %v239_v1 = vld [vmem:[%s6820_s1 + $0x278] sm:$0xff] }
  0x62   :  { %4555 = vmatmul.mubr.msk.f32.gmra.mrb[42].mxu0 %vm427_vm0, %v331_v21  ;;  %v352_v21 = vmul.f32 %v224_v19, %v96_v18  ;;  %v365_v62 = vmul.f32 %v237_v59, %v109_v58  ;;  %v367_v4 = vmul.f32 %v239_v1, %v111_v0  ;;  %v113_v6 = vld [vmem:[%s6819_s0 + $0x288] sm:$0xff]  ;;  %v115_v12 = vld [vmem:[%s6819_s0 + $0x298] sm:$0xff] }
  0x63   :  { %4557 = vmatprep.mubr.msk.f32.mxu0 %vm427_vm0, %v332_v22  ;;  %v97_v22 = vld [vmem:[%s6819_s0 + $0x208] sm:$0xff]  ;;  %v243_v13 = vld [vmem:[%s6820_s1 + $0x298] sm:$0xff] }
  0x64   :  { %v353_v26 = vmul.f32 %v225_v23, %v97_v22  ;;  %v241_v7 = vld [vmem:[%s6820_s1 + $0x288] sm:$0xff]  ;;  %v371_v16 = vmul.f32 %v243_v13, %v115_v12  ;;  %v119_v24 = vld [vmem:[%s6819_s0 + $0x2b8] sm:$0xff] }
  0x65   :  { %v369_v10 = vmul.f32 %v241_v7, %v113_v6  ;;  %v117_v18 = vld [vmem:[%s6819_s0 + $0x2a8] sm:$0xff]  ;;  %v247_v25 = vld [vmem:[%s6820_s1 + $0x2b8] sm:$0xff] }
  0x66   :  { %4558 = vmatmul.mubr.msk.f32.gmra.mrb[44].mxu0 %vm427_vm0, %v333_v29  ;;  %v227_v29 = vld [vmem:[%s6820_s1 + $0x218] sm:$0xff]  ;;  %v245_v19 = vld [vmem:[%s6820_s1 + $0x2a8] sm:$0xff] }
  0x67   :  { %4560 = vmatprep.mubr.msk.f32.mxu0 %vm427_vm0, %v334_v31  ;;  %v228_v31 = vld [vmem:[%s6820_s1 + $0x220] sm:$0xff]  ;;  %v355_v32 = vmul.f32 %v227_v29, %v99_v28  ;;  %v373_v22 = vmul.f32 %v245_v19, %v117_v18  ;;  %v375_v28 = vmul.f32 %v247_v25, %v119_v24 }
  0x68   :  { %v356_v33 = vmul.f32 %v228_v31, %v100_v30  ;;  %v121_v30 = vld [vmem:[%s6819_s0 + $0x2c8] sm:$0xff]  ;;  %v6019_v25 = vld [vmem:[%s6822_s3] ss:$0 sm:$0xff] }
  0x69   :  { %v249_v31 = vld [vmem:[%s6820_s1 + $0x2c8] sm:$0xff] }
  0x6a   :  { %4561 = vmatmul.mubr.msk.f32.gmra.mrb[46].mxu0 %vm427_vm0, %v335_v36  ;;  %v102_v36 = vld [vmem:[%s6819_s0 + $0x230] sm:$0xff]  ;;  %v377_v34 = vmul.f32 %v249_v31, %v121_v30 }
  0x6b   :  { %4563 = vmatprep.mubr.msk.f32.mxu0 %vm427_vm0, %v336_v37  ;;  %v230_v37 = vld [vmem:[%s6820_s1 + $0x230] sm:$0xff] }
  0x6c   :  { %v358_v39 = vmul.f32 %v230_v37, %v102_v36  ;;  %v123_v36 = vld [vmem:[%s6819_s0 + $0x2d8] sm:$0xff]  ;;  %v270_v30 = vld [vmem:[%s6820_s1 + $0x370] sm:$0xff] }
  0x6d   :  { %v251_v37 = vld [vmem:[%s6820_s1 + $0x2d8] sm:$0xff] }
  0x6e   :  { %4564 = vmatmul.mubr.msk.f32.gmra.mrb[48].mxu0 %vm427_vm0, %v337_v42  ;;  %v104_v42 = vld [vmem:[%s6819_s0 + $0x240] sm:$0xff]  ;;  %v379_v40 = vmul.f32 %v251_v37, %v123_v36  ;;  %v143_v37 = vld [vmem:[%s6819_s0 + $0x378] sm:$0xff] }
  0x6f   :  { %4566 = vmatprep.mubr.msk.f32.mxu0 %vm427_vm0, %v338_v43  ;;  %v232_v43 = vld [vmem:[%s6820_s1 + $0x240] sm:$0xff] }
  0x70   :  { %v360_v45 = vmul.f32 %v232_v43, %v104_v42  ;;  %v125_v42 = vld [vmem:[%s6819_s0 + $0x2e8] sm:$0xff] }
  0x71   :  { %v253_v43 = vld [vmem:[%s6820_s1 + $0x2e8] sm:$0xff] }
  0x72   :  { %4567 = vmatmul.mubr.msk.f32.gmra.mrb[50].mxu0 %vm427_vm0, %v339_v48  ;;  %v106_v48 = vld [vmem:[%s6819_s0 + $0x250] sm:$0xff]  ;;  %v381_v46 = vmul.f32 %v253_v43, %v125_v42 }
  0x73   :  { %4569 = vmatprep.mubr.msk.f32.mxu0 %vm427_vm0, %v340_v49  ;;  %v234_v49 = vld [vmem:[%s6820_s1 + $0x250] sm:$0xff] }
  0x74   :  { %v362_v51 = vmul.f32 %v234_v49, %v106_v48  ;;  %v127_v48 = vld [vmem:[%s6819_s0 + $0x2f8] sm:$0xff] }
  0x75   :  { %v255_v49 = vld [vmem:[%s6820_s1 + $0x2f8] sm:$0xff] }
  0x76   :  { %4570 = vmatmul.mubr.msk.f32.gmra.mrb[52].mxu0 %vm427_vm0, %v341_v54  ;;  %v108_v54 = vld [vmem:[%s6819_s0 + $0x260] sm:$0xff]  ;;  %v383_v52 = vmul.f32 %v255_v49, %v127_v48  ;;  %v145_v49 = vld [vmem:[%s6819_s0 + $0x388] sm:$0xff] }
  0x77   :  { %4572 = vmatprep.mubr.msk.f32.mxu0 %vm427_vm0, %v342_v55  ;;  %v236_v55 = vld [vmem:[%s6820_s1 + $0x260] sm:$0xff] }
  0x78   :  { %v364_v57 = vmul.f32 %v236_v55, %v108_v54  ;;  %v129_v54 = vld [vmem:[%s6819_s0 + $0x308] sm:$0xff] }
  0x79   :  { %v257_v55 = vld [vmem:[%s6820_s1 + $0x308] sm:$0xff] }
  0x7a   :  { %4573 = vmatmul.mubr.msk.f32.gmra.mrb[54].mxu0 %vm427_vm0, %v343_v60  ;;  %v110_v60 = vld [vmem:[%s6819_s0 + $0x270] sm:$0xff]  ;;  %v385_v58 = vmul.f32 %v257_v55, %v129_v54 }
  0x7b   :  { %4575 = vmatprep.mubr.msk.f32.mxu0 %vm427_vm0, %v344_v61  ;;  %v238_v61 = vld [vmem:[%s6820_s1 + $0x270] sm:$0xff] }
  0x7c   :  { %v366_v63 = vmul.f32 %v238_v61, %v110_v60  ;;  %v131_v60 = vld [vmem:[%s6819_s0 + $0x318] sm:$0xff] }
  0x7d   :  { %v259_v61 = vld [vmem:[%s6820_s1 + $0x318] sm:$0xff] }
  0x7e   :  { %4576 = vmatmul.mubr.msk.f32.gmra.mrb[56].mxu0 %vm427_vm0, %v345_v2  ;;  %v112_v2 = vld [vmem:[%s6819_s0 + $0x280] sm:$0xff]  ;;  %v387_v0 = vmul.f32 %v259_v61, %v131_v60  ;;  %v147_v61 = vld [vmem:[%s6819_s0 + $0x398] sm:$0xff] }
  0x7f   :  { %4578 = vmatprep.mubr.msk.f32.mxu0 %vm427_vm0, %v346_v3  ;;  %v240_v3 = vld [vmem:[%s6820_s1 + $0x280] sm:$0xff] }
  0x80   :  { %v368_v5 = vmul.f32 %v240_v3, %v112_v2  ;;  %v133_v2 = vld [vmem:[%s6819_s0 + $0x328] sm:$0xff] }
  0x81   :  { %v261_v3 = vld [vmem:[%s6820_s1 + $0x328] sm:$0xff] }
  0x82   :  { %4579 = vmatmul.mubr.msk.f32.gmra.mrb[58].mxu0 %vm427_vm0, %v347_v8  ;;  %v114_v8 = vld [vmem:[%s6819_s0 + $0x290] sm:$0xff]  ;;  %v389_v6 = vmul.f32 %v261_v3, %v133_v2 }
  0x83   :  { %4581 = vmatprep.mubr.msk.f32.mxu0 %vm427_vm0, %v348_v9  ;;  %v242_v9 = vld [vmem:[%s6820_s1 + $0x290] sm:$0xff] }
  0x84   :  { %v370_v11 = vmul.f32 %v242_v9, %v114_v8  ;;  %v135_v8 = vld [vmem:[%s6819_s0 + $0x338] sm:$0xff] }
  0x85   :  { %v263_v9 = vld [vmem:[%s6820_s1 + $0x338] sm:$0xff] }
  0x86   :  { %4582 = vmatmul.mubr.msk.f32.gmra.mrb[60].mxu0 %vm427_vm0, %v349_v14  ;;  %v116_v14 = vld [vmem:[%s6819_s0 + $0x2a0] sm:$0xff]  ;;  %v391_v12 = vmul.f32 %v263_v9, %v135_v8  ;;  %v149_v9 = vld [vmem:[%s6819_s0 + $0x3a8] sm:$0xff] }
  0x87   :  { %4584 = vmatprep.mubr.msk.f32.mxu0 %vm427_vm0, %v350_v15  ;;  %v244_v15 = vld [vmem:[%s6820_s1 + $0x2a0] sm:$0xff] }
  0x88   :  { %v372_v17 = vmul.f32 %v244_v15, %v116_v14  ;;  %v137_v14 = vld [vmem:[%s6819_s0 + $0x348] sm:$0xff] }
  0x89   :  { %v265_v15 = vld [vmem:[%s6820_s1 + $0x348] sm:$0xff] }
  0x8a   :  { %4585 = vmatmul.mubr.msk.f32.gmra.mrb[62].mxu0 %vm427_vm0, %v351_v20  ;;  %v118_v20 = vld [vmem:[%s6819_s0 + $0x2b0] sm:$0xff]  ;;  %v393_v18 = vmul.f32 %v265_v15, %v137_v14 }
  0x8b   :  { %4587 = vmatprep.mubr.msk.f32.mxu0 %vm427_vm0, %v352_v21  ;;  %v246_v21 = vld [vmem:[%s6820_s1 + $0x2b0] sm:$0xff] }
  0x8c   :  { %v374_v23 = vmul.f32 %v246_v21, %v118_v20  ;;  %v139_v20 = vld [vmem:[%s6819_s0 + $0x358] sm:$0xff] }
  0x8d   :  { %v267_v21 = vld [vmem:[%s6820_s1 + $0x358] sm:$0xff] }
  0x8e   :  { %4588 = vmatmul.mubr.msk.f32.gmra.mrb[64].mxu0 %vm427_vm0, %v353_v26  ;;  %v120_v26 = vld [vmem:[%s6819_s0 + $0x2c0] sm:$0xff]  ;;  %v395_v24 = vmul.f32 %v267_v21, %v139_v20  ;;  %v151_v21 = vld [vmem:[%s6819_s0 + $0x3b8] sm:$0xff] }
  0x8f   :  { %4590 = vmatprep.mubr.msk.f32.mxu0 %vm427_vm0, %v354_v27  ;;  %v248_v27 = vld [vmem:[%s6820_s1 + $0x2c0] sm:$0xff] }
  0x90   :  { %v376_v29 = vmul.f32 %v248_v27, %v120_v26  ;;  %v141_v27 = vld [vmem:[%s6819_s0 + $0x368] sm:$0xff] }
  0x92   :  { %4591 = vmatmul.mubr.msk.f32.gmra.mrb[66].mxu0 %vm427_vm0, %v355_v32  ;;  %v122_v32 = vld [vmem:[%s6819_s0 + $0x2d0] sm:$0xff] }
  0x93   :  { %4593 = vmatprep.mubr.msk.f32.mxu0 %vm427_vm0, %v356_v33  ;;  %v250_v33 = vld [vmem:[%s6820_s1 + $0x2d0] sm:$0xff] }
  0x94   :  { %v378_v35 = vmul.f32 %v250_v33, %v122_v32 }
  0x96   :  { %4594 = vmatmul.mubr.msk.f32.gmra.mrb[68].mxu0 %vm427_vm0, %v357_v38  ;;  %v124_v38 = vld [vmem:[%s6819_s0 + $0x2e0] sm:$0xff] }
  0x97   :  { %4596 = vmatprep.mubr.msk.f32.mxu0 %vm427_vm0, %v358_v39  ;;  %v252_v39 = vld [vmem:[%s6820_s1 + $0x2e0] sm:$0xff] }
  0x98   :  { %v380_v41 = vmul.f32 %v252_v39, %v124_v38  ;;  %v271_v38 = vld [vmem:[%s6820_s1 + $0x378] sm:$0xff]  ;;  %v144_v39 = vld [vmem:[%s6819_s0 + $0x380] sm:$0xff] }
  0x9a   :  { %4597 = vmatmul.mubr.msk.f32.gmra.mrb[70].mxu0 %vm427_vm0, %v359_v44  ;;  %v126_v44 = vld [vmem:[%s6819_s0 + $0x2f0] sm:$0xff] }
  0x9b   :  { %4599 = vmatprep.mubr.msk.f32.mxu0 %vm427_vm0, %v360_v45  ;;  %v254_v45 = vld [vmem:[%s6820_s1 + $0x2f0] sm:$0xff] }
  0x9c   :  { %v382_v47 = vmul.f32 %v254_v45, %v126_v44 }
  0x9e   :  { %4600 = vmatmul.mubr.msk.f32.gmra.mrb[72].mxu0 %vm427_vm0, %v361_v50  ;;  %v128_v50 = vld [vmem:[%s6819_s0 + $0x300] sm:$0xff] }
  0x9f   :  { %4602 = vmatprep.mubr.msk.f32.mxu0 %vm427_vm0, %v362_v51  ;;  %v256_v51 = vld [vmem:[%s6820_s1 + $0x300] sm:$0xff] }
  0xa0   :  { %v384_v53 = vmul.f32 %v256_v51, %v128_v50  ;;  %v273_v50 = vld [vmem:[%s6820_s1 + $0x388] sm:$0xff]  ;;  %v146_v51 = vld [vmem:[%s6819_s0 + $0x390] sm:$0xff] }
  0xa2   :  { %4603 = vmatmul.mubr.msk.f32.gmra.mrb[74].mxu0 %vm427_vm0, %v363_v56  ;;  %v130_v56 = vld [vmem:[%s6819_s0 + $0x310] sm:$0xff] }
  0xa3   :  { %4605 = vmatprep.mubr.msk.f32.mxu0 %vm427_vm0, %v364_v57  ;;  %v258_v57 = vld [vmem:[%s6820_s1 + $0x310] sm:$0xff] }
  0xa4   :  { %v386_v59 = vmul.f32 %v258_v57, %v130_v56 }
  0xa6   :  { %4606 = vmatmul.mubr.msk.f32.gmra.mrb[76].mxu0 %vm427_vm0, %v365_v62  ;;  %v132_v62 = vld [vmem:[%s6819_s0 + $0x320] sm:$0xff] }
  0xa7   :  { %4608 = vmatprep.mubr.msk.f32.mxu0 %vm427_vm0, %v366_v63  ;;  %v260_v63 = vld [vmem:[%s6820_s1 + $0x320] sm:$0xff] }
  0xa8   :  { %v388_v1 = vmul.f32 %v260_v63, %v132_v62  ;;  %v275_v62 = vld [vmem:[%s6820_s1 + $0x398] sm:$0xff]  ;;  %v148_v63 = vld [vmem:[%s6819_s0 + $0x3a0] sm:$0xff] }
  0xaa   :  { %4609 = vmatmul.mubr.msk.f32.gmra.mrb[78].mxu0 %vm427_vm0, %v367_v4  ;;  %v134_v4 = vld [vmem:[%s6819_s0 + $0x330] sm:$0xff] }
  0xab   :  { %4611 = vmatprep.mubr.msk.f32.mxu0 %vm427_vm0, %v368_v5  ;;  %v262_v5 = vld [vmem:[%s6820_s1 + $0x330] sm:$0xff] }
  0xac   :  { %v390_v7 = vmul.f32 %v262_v5, %v134_v4 }
  0xae   :  { %4612 = vmatmul.mubr.msk.f32.gmra.mrb[80].mxu0 %vm427_vm0, %v369_v10  ;;  %v136_v10 = vld [vmem:[%s6819_s0 + $0x340] sm:$0xff] }
  0xaf   :  { %4614 = vmatprep.mubr.msk.f32.mxu0 %vm427_vm0, %v370_v11  ;;  %v264_v11 = vld [vmem:[%s6820_s1 + $0x340] sm:$0xff] }
  0xb0   :  { %v392_v13 = vmul.f32 %v264_v11, %v136_v10  ;;  %v277_v10 = vld [vmem:[%s6820_s1 + $0x3a8] sm:$0xff]  ;;  %v150_v11 = vld [vmem:[%s6819_s0 + $0x3b0] sm:$0xff] }
  0xb2   :  { %4615 = vmatmul.mubr.msk.f32.gmra.mrb[82].mxu0 %vm427_vm0, %v371_v16  ;;  %v138_v16 = vld [vmem:[%s6819_s0 + $0x350] sm:$0xff] }
  0xb3   :  { %4617 = vmatprep.mubr.msk.f32.mxu0 %vm427_vm0, %v372_v17  ;;  %v266_v17 = vld [vmem:[%s6820_s1 + $0x350] sm:$0xff] }
  0xb4   :  { %v394_v19 = vmul.f32 %v266_v17, %v138_v16 }
  0xb6   :  { %4618 = vmatmul.mubr.msk.f32.gmra.mrb[84].mxu0 %vm427_vm0, %v373_v22  ;;  %v140_v22 = vld [vmem:[%s6819_s0 + $0x360] sm:$0xff] }
  0xb7   :  { %4620 = vmatprep.mubr.msk.f32.mxu0 %vm427_vm0, %v374_v23  ;;  %v268_v23 = vld [vmem:[%s6820_s1 + $0x360] sm:$0xff] }
  0xb8   :  { %v396_v26 = vmul.f32 %v268_v23, %v140_v22  ;;  %v279_v22 = vld [vmem:[%s6820_s1 + $0x3b8] sm:$0xff]  ;;  %v152_v23 = vld [vmem:[%s6819_s0 + $0x3c0] sm:$0xff] }
  0xba   :  { %4621 = vmatmul.mubr.msk.f32.gmra.mrb[86].mxu0 %vm427_vm0, %v375_v28  ;;  %v269_v28 = vld [vmem:[%s6820_s1 + $0x368] sm:$0xff] }
  0xbb   :  { %4623 = vmatprep.mubr.msk.f32.mxu0 %vm427_vm0, %v376_v29  ;;  %v142_v29 = vld [vmem:[%s6819_s0 + $0x370] sm:$0xff] }
  0xbc   :  { %v398_v36 = vmul.f32 %v270_v30, %v142_v29 }
  0xbe   :  { %4624 = vmatmul.mubr.msk.f32.gmra.mrb[88].mxu0 %vm427_vm0, %v377_v34  ;;  %v397_v34 = vmul.f32 %v269_v28, %v141_v27 }
  0xbf   :  { %4626 = vmatprep.mubr.msk.f32.mxu0 %vm427_vm0, %v378_v35 }
  0xc2   :  { %4627 = vmatmul.mubr.msk.f32.gmra.mrb[90].mxu0 %vm427_vm0, %v379_v40  ;;  %v272_v40 = vld [vmem:[%s6820_s1 + $0x380] sm:$0xff] }
  0xc3   :  { %4629 = vmatprep.mubr.msk.f32.mxu0 %vm427_vm0, %v380_v41  ;;  %v400_v48 = vmul.f32 %v272_v40, %v144_v39 }
  0xc6   :  { %4630 = vmatmul.mubr.msk.f32.gmra.mrb[92].mxu0 %vm427_vm0, %v381_v46  ;;  %v399_v46 = vmul.f32 %v271_v38, %v143_v37  ;;  %v282_v37 = vld [vmem:[%s6820_s1 + $0x3d0] sm:$0xff] }
  0xc7   :  { %4632 = vmatprep.mubr.msk.f32.mxu0 %vm427_vm0, %v382_v47 }
  0xca   :  { %4633 = vmatmul.mubr.msk.f32.gmra.mrb[94].mxu0 %vm427_vm0, %v383_v52  ;;  %v274_v52 = vld [vmem:[%s6820_s1 + $0x390] sm:$0xff] }
  0xcb   :  { %4635 = vmatprep.mubr.msk.f32.mxu0 %vm427_vm0, %v384_v53  ;;  %v402_v60 = vmul.f32 %v274_v52, %v146_v51 }
  0xce   :  { %4636 = vmatmul.mubr.msk.f32.gmra.mrb[96].mxu0 %vm427_vm0, %v385_v58  ;;  %v401_v58 = vmul.f32 %v273_v50, %v145_v49  ;;  %v284_v49 = vld [vmem:[%s6820_s1 + $0x3e0] sm:$0xff] }
  0xcf   :  { %4638 = vmatprep.mubr.msk.f32.mxu0 %vm427_vm0, %v386_v59 }
  0xd2   :  { %4639 = vmatmul.mubr.msk.f32.gmra.mrb[98].mxu0 %vm427_vm0, %v387_v0  ;;  %v276_v0 = vld [vmem:[%s6820_s1 + $0x3a0] sm:$0xff] }
  0xd3   :  { %4641 = vmatprep.mubr.msk.f32.mxu0 %vm427_vm0, %v388_v1  ;;  %v404_v8 = vmul.f32 %v276_v0, %v148_v63 }
  0xd6   :  { %4642 = vmatmul.mubr.msk.f32.gmra.mrb[100].mxu0 %vm427_vm0, %v389_v6  ;;  %v403_v6 = vmul.f32 %v275_v62, %v147_v61  ;;  %v286_v61 = vld [vmem:[%s6820_s1 + $0x3f0] sm:$0xff] }
  0xd7   :  { %4644 = vmatprep.mubr.msk.f32.mxu0 %vm427_vm0, %v390_v7 }
  0xda   :  { %4645 = vmatmul.mubr.msk.f32.gmra.mrb[102].mxu0 %vm427_vm0, %v391_v12  ;;  %v278_v12 = vld [vmem:[%s6820_s1 + $0x3b0] sm:$0xff] }
  0xdb   :  { %4647 = vmatprep.mubr.msk.f32.mxu0 %vm427_vm0, %v392_v13  ;;  %v406_v20 = vmul.f32 %v278_v12, %v150_v11 }
  0xde   :  { %4648 = vmatmul.mubr.msk.f32.gmra.mrb[104].mxu0 %vm427_vm0, %v393_v18  ;;  %v405_v18 = vmul.f32 %v277_v10, %v149_v9 }
  0xdf   :  { %4650 = vmatprep.mubr.msk.f32.mxu0 %vm427_vm0, %v394_v19 }
  0xe1   :  { %v4493_v31 = vpop.f32.mrb[0].mxu0 }
  0xe2   :  { %v884_v32 = vadd.f32 %v4493_v31, %v6019_v25  ;;  %v878_v33 = vpop.f32.mrb[1].mxu0  ;;  %4651 = vmatmul.mubr.msk.f32.gmra.mrb[106].mxu0 %vm427_vm0, %v395_v24  ;;  %v280_v24 = vld [vmem:[%s6820_s1 + $0x3c0] sm:$0xff]  ;;  %v407_v31 = vmul.f32 %v279_v22, %v151_v21 }
  0xe3   :  { %v879_v35 = vadd.f32 %v6019_v25, %v878_v33  ;;  %4653 = vmatprep.mubr.msk.f32.mxu0 %vm427_vm0, %v396_v26  ;;  %v408_v33 = vmul.f32 %v280_v24, %v152_v23 }
  0xe4   :  { %v1518_v43 = vmax.f32 %v884_v32, 0.0 }
  0xe5   :  { %v1517_v41 = vmax.f32 %v879_v35, 0.0  ;;  %v4496_v42 = vpop.f32.mrb[2].mxu0  ;;  %v281_v35 = vld [vmem:[%s6820_s1 + $0x3c8] sm:$0xff] }
  0xe6   :  { %v894_v44 = vadd.f32 %v4496_v42, %v6019_v25  ;;  %v888_v45 = vpop.f32.mrb[3].mxu0  ;;  %4654 = vmatmul.mubr.msk.f32.gmra.mrb[108].mxu0 %vm427_vm0, %v397_v34  ;;  %v153_v34 = vld [vmem:[%s6819_s0 + $0x3c8] sm:$0xff] }
  0xe7   :  { %v889_v47 = vadd.f32 %v6019_v25, %v888_v45  ;;  %4699 = vmatprep.mubr.msk.f32.mxu1 %vm1660_vm1, %v1517_v41  ;;  %4656 = vmatprep.mubr.msk.f32.mxu0 %vm427_vm0, %v398_v36  ;;  %v154_v36 = vld [vmem:[%s6819_s0 + $0x3d0] sm:$0xff] }
  0xe8   :  { %4700 = vmatmul.mubr.msk.f32.vlgmr.msra.gmra.mrb[0].mxu1 %vm1660_vm1, %v1518_v43  ;;  %v1520_v55 = vmax.f32 %v894_v44, 0.0  ;;  %v409_v43 = vmul.f32 %v281_v35, %v153_v34  ;;  %v410_v45 = vmul.f32 %v282_v37, %v154_v36 }
  0xe9   :  { %v1519_v53 = vmax.f32 %v889_v47, 0.0  ;;  %v4499_v54 = vpop.f32.mrb[4].mxu0  ;;  %v283_v47 = vld [vmem:[%s6820_s1 + $0x3d8] sm:$0xff] }
  0xea   :  { %v904_v56 = vadd.f32 %v4499_v54, %v6019_v25  ;;  %v898_v57 = vpop.f32.mrb[5].mxu0  ;;  %4657 = vmatmul.mubr.msk.f32.gmra.mrb[110].mxu0 %vm427_vm0, %v399_v46  ;;  %v155_v46 = vld [vmem:[%s6819_s0 + $0x3d8] sm:$0xff] }
  0xeb   :  { %v899_v59 = vadd.f32 %v6019_v25, %v898_v57  ;;  %4702 = vmatprep.mubr.msk.f32.mxu1 %vm1660_vm1, %v1519_v53  ;;  %4659 = vmatprep.mubr.msk.f32.mxu0 %vm427_vm0, %v400_v48  ;;  %v156_v48 = vld [vmem:[%s6819_s0 + $0x3e0] sm:$0xff] }
  0xec   :  { %4703 = vmatmul.mubr.msk.f32.gmra.mrb[2].mxu1 %vm1660_vm1, %v1520_v55  ;;  %v1522_v3 = vmax.f32 %v904_v56, 0.0  ;;  %v411_v55 = vmul.f32 %v283_v47, %v155_v46  ;;  %v412_v57 = vmul.f32 %v284_v49, %v156_v48 }
  0xed   :  { %v1521_v1 = vmax.f32 %v899_v59, 0.0  ;;  %v4502_v2 = vpop.f32.mrb[6].mxu0  ;;  %v285_v59 = vld [vmem:[%s6820_s1 + $0x3e8] sm:$0xff] }
  0xee   :  { %v914_v4 = vadd.f32 %v4502_v2, %v6019_v25  ;;  %v908_v5 = vpop.f32.mrb[7].mxu0  ;;  %4660 = vmatmul.mubr.msk.f32.gmra.mrb[112].mxu0 %vm427_vm0, %v401_v58  ;;  %v157_v58 = vld [vmem:[%s6819_s0 + $0x3e8] sm:$0xff] }
  0xef   :  { %v909_v7 = vadd.f32 %v6019_v25, %v908_v5  ;;  %4705 = vmatprep.mubr.msk.f32.mxu1 %vm1660_vm1, %v1521_v1  ;;  %4662 = vmatprep.mubr.msk.f32.mxu0 %vm427_vm0, %v402_v60  ;;  %v158_v60 = vld [vmem:[%s6819_s0 + $0x3f0] sm:$0xff] }
  0xf0   :  { %4706 = vmatmul.mubr.msk.f32.gmra.mrb[4].mxu1 %vm1660_vm1, %v1522_v3  ;;  %v1524_v15 = vmax.f32 %v914_v4, 0.0  ;;  %v413_v3 = vmul.f32 %v285_v59, %v157_v58  ;;  %v414_v5 = vmul.f32 %v286_v61, %v158_v60 }
  0xf1   :  { %v1523_v13 = vmax.f32 %v909_v7, 0.0  ;;  %v4505_v14 = vpop.f32.mrb[8].mxu0  ;;  %v287_v7 = vld [vmem:[%s6820_s1 + $0x3f8] sm:$0xff] }
  0xf2   :  { %v924_v16 = vadd.f32 %v4505_v14, %v6019_v25  ;;  %v918_v17 = vpop.f32.mrb[9].mxu0  ;;  %4663 = vmatmul.mubr.msk.f32.gmra.mrb[114].mxu0 %vm427_vm0, %v403_v6  ;;  %v159_v6 = vld [vmem:[%s6819_s0 + $0x3f8] sm:$0xff] }
  0xf3   :  { %v919_v19 = vadd.f32 %v6019_v25, %v918_v17  ;;  %4708 = vmatprep.mubr.msk.f32.mxu1 %vm1660_vm1, %v1523_v13  ;;  %4665 = vmatprep.mubr.msk.f32.mxu0 %vm427_vm0, %v404_v8  ;;  %v415_v13 = vmul.f32 %v287_v7, %v159_v6 }
  0xf4   :  { %4709 = vmatmul.mubr.msk.f32.gmra.mrb[6].mxu1 %vm1660_vm1, %v1524_v15  ;;  %v1526_v28 = vmax.f32 %v924_v16, 0.0 }
  0xf5   :  { %v1525_v26 = vmax.f32 %v919_v19, 0.0  ;;  %v4508_v27 = vpop.f32.mrb[10].mxu0 }
  0xf6   :  { %v934_v29 = vadd.f32 %v4508_v27, %v6019_v25  ;;  %v928_v30 = vpop.f32.mrb[11].mxu0  ;;  %4666 = vmatmul.mubr.msk.f32.gmra.mrb[116].mxu0 %vm427_vm0, %v405_v18 }
  0xf7   :  { %v929_v32 = vadd.f32 %v6019_v25, %v928_v30  ;;  %4711 = vmatprep.mubr.msk.f32.mxu1 %vm1660_vm1, %v1525_v26  ;;  %4668 = vmatprep.mubr.msk.f32.mxu0 %vm427_vm0, %v406_v20 }
  0xf8   :  { %4712 = vmatmul.mubr.msk.f32.gmra.mrb[8].mxu1 %vm1660_vm1, %v1526_v28  ;;  %v1528_v40 = vmax.f32 %v934_v29, 0.0 }
  0xf9   :  { %v1527_v38 = vmax.f32 %v929_v32, 0.0  ;;  %v4511_v39 = vpop.f32.mrb[12].mxu0 }
  0xfa   :  { %v944_v41 = vadd.f32 %v4511_v39, %v6019_v25  ;;  %v938_v42 = vpop.f32.mrb[13].mxu0  ;;  %4669 = vmatmul.mubr.msk.f32.gmra.mrb[118].mxu0 %vm427_vm0, %v407_v31 }
  0xfb   :  { %v939_v44 = vadd.f32 %v6019_v25, %v938_v42  ;;  %4714 = vmatprep.mubr.msk.f32.mxu1 %vm1660_vm1, %v1527_v38  ;;  %4671 = vmatprep.mubr.msk.f32.mxu0 %vm427_vm0, %v408_v33 }
  0xfc   :  { %4715 = vmatmul.mubr.msk.f32.gmra.mrb[10].mxu1 %vm1660_vm1, %v1528_v40  ;;  %v1530_v52 = vmax.f32 %v944_v41, 0.0 }
  0xfd   :  { %v1529_v50 = vmax.f32 %v939_v44, 0.0  ;;  %v4514_v51 = vpop.f32.mrb[14].mxu0 }
  0xfe   :  { %v954_v53 = vadd.f32 %v4514_v51, %v6019_v25  ;;  %v948_v54 = vpop.f32.mrb[15].mxu0  ;;  %4672 = vmatmul.mubr.msk.f32.gmra.mrb[120].mxu0 %vm427_vm0, %v409_v43 }
  0xff   :  { %v949_v56 = vadd.f32 %v6019_v25, %v948_v54  ;;  %4717 = vmatprep.mubr.msk.f32.mxu1 %vm1660_vm1, %v1529_v50  ;;  %4674 = vmatprep.mubr.msk.f32.mxu0 %vm427_vm0, %v410_v45 }
 0x100   :  { %4718 = vmatmul.mubr.msk.f32.gmra.mrb[12].mxu1 %vm1660_vm1, %v1530_v52  ;;  %v1532_v0 = vmax.f32 %v954_v53, 0.0 }
 0x101   :  { %v1531_v62 = vmax.f32 %v949_v56, 0.0  ;;  %v4517_v63 = vpop.f32.mrb[16].mxu0 }
 0x102   :  { %v964_v1 = vadd.f32 %v4517_v63, %v6019_v25  ;;  %v958_v2 = vpop.f32.mrb[17].mxu0  ;;  %4675 = vmatmul.mubr.msk.f32.gmra.mrb[122].mxu0 %vm427_vm0, %v411_v55 }
 0x103   :  { %v959_v4 = vadd.f32 %v6019_v25, %v958_v2  ;;  %4720 = vmatprep.mubr.msk.f32.mxu1 %vm1660_vm1, %v1531_v62  ;;  %4677 = vmatprep.mubr.msk.f32.mxu0 %vm427_vm0, %v412_v57 }
 0x104   :  { %4721 = vmatmul.mubr.msk.f32.gmra.mrb[14].mxu1 %vm1660_vm1, %v1532_v0  ;;  %v1534_v10 = vmax.f32 %v964_v1, 0.0 }
 0x105   :  { %v1533_v8 = vmax.f32 %v959_v4, 0.0  ;;  %v4520_v9 = vpop.f32.mrb[18].mxu0 }
 0x106   :  { %v974_v11 = vadd.f32 %v4520_v9, %v6019_v25  ;;  %v968_v12 = vpop.f32.mrb[19].mxu0  ;;  %4678 = vmatmul.mubr.msk.f32.gmra.mrb[124].mxu0 %vm427_vm0, %v413_v3 }
 0x107   :  { %v969_v14 = vadd.f32 %v6019_v25, %v968_v12  ;;  %4723 = vmatprep.mubr.msk.f32.mxu1 %vm1660_vm1, %v1533_v8  ;;  %4680 = vmatprep.mubr.msk.f32.mxu0 %vm427_vm0, %v414_v5 }
 0x108   :  { %4724 = vmatmul.mubr.msk.f32.gmra.mrb[16].mxu1 %vm1660_vm1, %v1534_v10  ;;  %v1536_v17 = vmax.f32 %v974_v11, 0.0 }
 0x109   :  { %v1535_v15 = vmax.f32 %v969_v14, 0.0  ;;  %v4523_v16 = vpop.f32.mrb[20].mxu0 }
 0x10a   :  { %v984_v18 = vadd.f32 %v4523_v16, %v6019_v25  ;;  %v978_v19 = vpop.f32.mrb[21].mxu0  ;;  %4681 = vmatmul.mubr.msk.f32.gmra.mrb[126].mxu0 %vm427_vm0, %v415_v13 }
 0x10b   :  { %v979_v20 = vadd.f32 %v6019_v25, %v978_v19  ;;  %4726 = vmatprep.mubr.msk.f32.mxu1 %vm1660_vm1, %v1535_v15 }
 0x10c   :  { %4727 = vmatmul.mubr.msk.f32.gmra.mrb[18].mxu1 %vm1660_vm1, %v1536_v17  ;;  %v1538_v23 = vmax.f32 %v984_v18, 0.0 }
 0x10d   :  { %v1537_v21 = vmax.f32 %v979_v20, 0.0  ;;  %v4526_v22 = vpop.f32.mrb[22].mxu0 }
 0x10e   :  { %v994_v24 = vadd.f32 %v4526_v22, %v6019_v25  ;;  %v988_v26 = vpop.f32.mrb[23].mxu0 }
 0x10f   :  { %v989_v27 = vadd.f32 %v6019_v25, %v988_v26  ;;  %4729 = vmatprep.mubr.msk.f32.mxu1 %vm1660_vm1, %v1537_v21 }
 0x110   :  { %4730 = vmatmul.mubr.msk.f32.gmra.mrb[20].mxu1 %vm1660_vm1, %v1538_v23  ;;  %v1540_v30 = vmax.f32 %v994_v24, 0.0 }
 0x111   :  { %v1539_v28 = vmax.f32 %v989_v27, 0.0  ;;  %v4529_v29 = vpop.f32.mrb[24].mxu0 }
 0x112   :  { %v1004_v31 = vadd.f32 %v4529_v29, %v6019_v25  ;;  %v998_v32 = vpop.f32.mrb[25].mxu0 }
 0x113   :  { %v999_v33 = vadd.f32 %v6019_v25, %v998_v32  ;;  %4732 = vmatprep.mubr.msk.f32.mxu1 %vm1660_vm1, %v1539_v28 }
 0x114   :  { %4733 = vmatmul.mubr.msk.f32.gmra.mrb[22].mxu1 %vm1660_vm1, %v1540_v30  ;;  %v1542_v36 = vmax.f32 %v1004_v31, 0.0 }
 0x115   :  { %v1541_v34 = vmax.f32 %v999_v33, 0.0  ;;  %v4532_v35 = vpop.f32.mrb[26].mxu0 }
 0x116   :  { %v1014_v37 = vadd.f32 %v4532_v35, %v6019_v25  ;;  %v1008_v38 = vpop.f32.mrb[27].mxu0 }
 0x117   :  { %v1009_v39 = vadd.f32 %v6019_v25, %v1008_v38  ;;  %4735 = vmatprep.mubr.msk.f32.mxu1 %vm1660_vm1, %v1541_v34 }
 0x118   :  { %4736 = vmatmul.mubr.msk.f32.gmra.mrb[24].mxu1 %vm1660_vm1, %v1542_v36  ;;  %v1544_v42 = vmax.f32 %v1014_v37, 0.0 }
 0x119   :  { %v1543_v40 = vmax.f32 %v1009_v39, 0.0  ;;  %v4535_v41 = vpop.f32.mrb[28].mxu0 }
 0x11a   :  { %v1024_v43 = vadd.f32 %v4535_v41, %v6019_v25  ;;  %v1018_v44 = vpop.f32.mrb[29].mxu0 }
 0x11b   :  { %v1019_v45 = vadd.f32 %v6019_v25, %v1018_v44  ;;  %4738 = vmatprep.mubr.msk.f32.mxu1 %vm1660_vm1, %v1543_v40 }
 0x11c   :  { %4739 = vmatmul.mubr.msk.f32.gmra.mrb[26].mxu1 %vm1660_vm1, %v1544_v42  ;;  %v1546_v48 = vmax.f32 %v1024_v43, 0.0 }
 0x11d   :  { %v1545_v46 = vmax.f32 %v1019_v45, 0.0  ;;  %v4538_v47 = vpop.f32.mrb[30].mxu0 }
 0x11e   :  { %v1034_v49 = vadd.f32 %v4538_v47, %v6019_v25  ;;  %v1028_v50 = vpop.f32.mrb[31].mxu0 }
 0x11f   :  { %v1029_v51 = vadd.f32 %v6019_v25, %v1028_v50  ;;  %4741 = vmatprep.mubr.msk.f32.mxu1 %vm1660_vm1, %v1545_v46 }
 0x120   :  { %4742 = vmatmul.mubr.msk.f32.gmra.mrb[28].mxu1 %vm1660_vm1, %v1546_v48  ;;  %v1548_v54 = vmax.f32 %v1034_v49, 0.0 }
 0x121   :  { %v1547_v52 = vmax.f32 %v1029_v51, 0.0  ;;  %v4541_v53 = vpop.f32.mrb[32].mxu0 }
 0x122   :  { %v1044_v55 = vadd.f32 %v4541_v53, %v6019_v25  ;;  %v1038_v56 = vpop.f32.mrb[33].mxu0 }
 0x123   :  { %v1039_v57 = vadd.f32 %v6019_v25, %v1038_v56  ;;  %4744 = vmatprep.mubr.msk.f32.mxu1 %vm1660_vm1, %v1547_v52 }
 0x124   :  { %4745 = vmatmul.mubr.msk.f32.gmra.mrb[30].mxu1 %vm1660_vm1, %v1548_v54  ;;  %v1550_v60 = vmax.f32 %v1044_v55, 0.0 }
 0x125   :  { %v1549_v58 = vmax.f32 %v1039_v57, 0.0  ;;  %v4544_v59 = vpop.f32.mrb[34].mxu0 }
 0x126   :  { %v1054_v61 = vadd.f32 %v4544_v59, %v6019_v25  ;;  %v1048_v62 = vpop.f32.mrb[35].mxu0 }
 0x127   :  { %v1049_v63 = vadd.f32 %v6019_v25, %v1048_v62  ;;  %4747 = vmatprep.mubr.msk.f32.mxu1 %vm1660_vm1, %v1549_v58 }
 0x128   :  { %4748 = vmatmul.mubr.msk.f32.gmra.mrb[32].mxu1 %vm1660_vm1, %v1550_v60  ;;  %v1552_v2 = vmax.f32 %v1054_v61, 0.0 }
 0x129   :  { %v1551_v0 = vmax.f32 %v1049_v63, 0.0  ;;  %v4547_v1 = vpop.f32.mrb[36].mxu0 }
 0x12a   :  { %v1064_v3 = vadd.f32 %v4547_v1, %v6019_v25  ;;  %v1058_v4 = vpop.f32.mrb[37].mxu0 }
 0x12b   :  { %v1059_v5 = vadd.f32 %v6019_v25, %v1058_v4  ;;  %4750 = vmatprep.mubr.msk.f32.mxu1 %vm1660_vm1, %v1551_v0 }
 0x12c   :  { %4751 = vmatmul.mubr.msk.f32.gmra.mrb[34].mxu1 %vm1660_vm1, %v1552_v2  ;;  %v1554_v8 = vmax.f32 %v1064_v3, 0.0 }
 0x12d   :  { %v1553_v6 = vmax.f32 %v1059_v5, 0.0  ;;  %v4550_v7 = vpop.f32.mrb[38].mxu0 }
 0x12e   :  { %v1074_v9 = vadd.f32 %v4550_v7, %v6019_v25  ;;  %v1068_v10 = vpop.f32.mrb[39].mxu0 }
 0x12f   :  { %v1069_v11 = vadd.f32 %v6019_v25, %v1068_v10  ;;  %4753 = vmatprep.mubr.msk.f32.mxu1 %vm1660_vm1, %v1553_v6 }
 0x130   :  { %4754 = vmatmul.mubr.msk.f32.gmra.mrb[36].mxu1 %vm1660_vm1, %v1554_v8  ;;  %v1556_v14 = vmax.f32 %v1074_v9, 0.0 }
 0x131   :  { %v1555_v12 = vmax.f32 %v1069_v11, 0.0  ;;  %v4553_v13 = vpop.f32.mrb[40].mxu0 }
 0x132   :  { %v1084_v15 = vadd.f32 %v4553_v13, %v6019_v25  ;;  %v1078_v16 = vpop.f32.mrb[41].mxu0 }
 0x133   :  { %v1079_v17 = vadd.f32 %v6019_v25, %v1078_v16  ;;  %4756 = vmatprep.mubr.msk.f32.mxu1 %vm1660_vm1, %v1555_v12 }
 0x134   :  { %4757 = vmatmul.mubr.msk.f32.gmra.mrb[38].mxu1 %vm1660_vm1, %v1556_v14  ;;  %v1558_v20 = vmax.f32 %v1084_v15, 0.0 }
 0x135   :  { %v1557_v18 = vmax.f32 %v1079_v17, 0.0  ;;  %v4556_v19 = vpop.f32.mrb[42].mxu0 }
 0x136   :  { %v1094_v21 = vadd.f32 %v4556_v19, %v6019_v25  ;;  %v1088_v22 = vpop.f32.mrb[43].mxu0 }
 0x137   :  { %v1089_v23 = vadd.f32 %v6019_v25, %v1088_v22  ;;  %4759 = vmatprep.mubr.msk.f32.mxu1 %vm1660_vm1, %v1557_v18 }
 0x138   :  { %4760 = vmatmul.mubr.msk.f32.gmra.mrb[40].mxu1 %vm1660_vm1, %v1558_v20  ;;  %v1560_v27 = vmax.f32 %v1094_v21, 0.0 }
 0x139   :  { %v1559_v24 = vmax.f32 %v1089_v23, 0.0  ;;  %v4559_v26 = vpop.f32.mrb[44].mxu0 }
 0x13a   :  { %v1104_v28 = vadd.f32 %v4559_v26, %v6019_v25  ;;  %v1098_v29 = vpop.f32.mrb[45].mxu0 }
 0x13b   :  { %v1099_v30 = vadd.f32 %v6019_v25, %v1098_v29  ;;  %4762 = vmatprep.mubr.msk.f32.mxu1 %vm1660_vm1, %v1559_v24 }
 0x13c   :  { %4763 = vmatmul.mubr.msk.f32.gmra.mrb[42].mxu1 %vm1660_vm1, %v1560_v27  ;;  %v1562_v33 = vmax.f32 %v1104_v28, 0.0 }
 0x13d   :  { %v1561_v31 = vmax.f32 %v1099_v30, 0.0  ;;  %v4562_v32 = vpop.f32.mrb[46].mxu0 }
 0x13e   :  { %v1114_v34 = vadd.f32 %v4562_v32, %v6019_v25  ;;  %v1108_v35 = vpop.f32.mrb[47].mxu0 }
 0x13f   :  { %v1109_v36 = vadd.f32 %v6019_v25, %v1108_v35  ;;  %4765 = vmatprep.mubr.msk.f32.mxu1 %vm1660_vm1, %v1561_v31 }
 0x140   :  { %4766 = vmatmul.mubr.msk.f32.gmra.mrb[44].mxu1 %vm1660_vm1, %v1562_v33  ;;  %v1564_v39 = vmax.f32 %v1114_v34, 0.0 }
 0x141   :  { %v1563_v37 = vmax.f32 %v1109_v36, 0.0  ;;  %v4565_v38 = vpop.f32.mrb[48].mxu0 }
 0x142   :  { %v1124_v40 = vadd.f32 %v4565_v38, %v6019_v25  ;;  %v1118_v41 = vpop.f32.mrb[49].mxu0 }
 0x143   :  { %v1119_v42 = vadd.f32 %v6019_v25, %v1118_v41  ;;  %4768 = vmatprep.mubr.msk.f32.mxu1 %vm1660_vm1, %v1563_v37 }
 0x144   :  { %4769 = vmatmul.mubr.msk.f32.gmra.mrb[46].mxu1 %vm1660_vm1, %v1564_v39  ;;  %v1566_v45 = vmax.f32 %v1124_v40, 0.0 }
 0x145   :  { %v1565_v43 = vmax.f32 %v1119_v42, 0.0  ;;  %v4568_v44 = vpop.f32.mrb[50].mxu0 }
 0x146   :  { %v1134_v46 = vadd.f32 %v4568_v44, %v6019_v25  ;;  %v1128_v47 = vpop.f32.mrb[51].mxu0 }
 0x147   :  { %4771 = vmatprep.mubr.msk.f32.mxu1 %vm1660_vm1, %v1565_v43  ;;  %v1129_v48 = vadd.f32 %v6019_v25, %v1128_v47 }
 0x148   :  { %4772 = vmatmul.mubr.msk.f32.gmra.mrb[48].mxu1 %vm1660_vm1, %v1566_v45  ;;  %v1568_v51 = vmax.f32 %v1134_v46, 0.0 }
 0x149   :  { %v1567_v49 = vmax.f32 %v1129_v48, 0.0  ;;  %v4571_v50 = vpop.f32.mrb[52].mxu0 }
 0x14a   :  { %v1144_v52 = vadd.f32 %v4571_v50, %v6019_v25  ;;  %v1138_v53 = vpop.f32.mrb[53].mxu0 }
 0x14b   :  { %4774 = vmatprep.mubr.msk.f32.mxu1 %vm1660_vm1, %v1567_v49  ;;  %v1139_v54 = vadd.f32 %v6019_v25, %v1138_v53 }
 0x14c   :  { %4775 = vmatmul.mubr.msk.f32.gmra.mrb[50].mxu1 %vm1660_vm1, %v1568_v51  ;;  %v1570_v57 = vmax.f32 %v1144_v52, 0.0 }
 0x14d   :  { %v1569_v55 = vmax.f32 %v1139_v54, 0.0  ;;  %v4574_v56 = vpop.f32.mrb[54].mxu0 }
 0x14e   :  { %v1154_v58 = vadd.f32 %v4574_v56, %v6019_v25  ;;  %v1148_v59 = vpop.f32.mrb[55].mxu0 }
 0x14f   :  { %4777 = vmatprep.mubr.msk.f32.mxu1 %vm1660_vm1, %v1569_v55  ;;  %v1149_v60 = vadd.f32 %v6019_v25, %v1148_v59 }
 0x150   :  { %4778 = vmatmul.mubr.msk.f32.gmra.mrb[52].mxu1 %vm1660_vm1, %v1570_v57  ;;  %v1572_v63 = vmax.f32 %v1154_v58, 0.0 }
 0x151   :  { %v1571_v61 = vmax.f32 %v1149_v60, 0.0  ;;  %v4577_v62 = vpop.f32.mrb[56].mxu0 }
 0x152   :  { %v1164_v0 = vadd.f32 %v4577_v62, %v6019_v25  ;;  %v1158_v1 = vpop.f32.mrb[57].mxu0 }
 0x153   :  { %4780 = vmatprep.mubr.msk.f32.mxu1 %vm1660_vm1, %v1571_v61  ;;  %v1159_v2 = vadd.f32 %v6019_v25, %v1158_v1 }
 0x154   :  { %4781 = vmatmul.mubr.msk.f32.gmra.mrb[54].mxu1 %vm1660_vm1, %v1572_v63  ;;  %v1574_v5 = vmax.f32 %v1164_v0, 0.0 }
 0x155   :  { %v1573_v3 = vmax.f32 %v1159_v2, 0.0  ;;  %v4580_v4 = vpop.f32.mrb[58].mxu0 }
 0x156   :  { %v1174_v6 = vadd.f32 %v4580_v4, %v6019_v25  ;;  %v1168_v7 = vpop.f32.mrb[59].mxu0 }
 0x157   :  { %4783 = vmatprep.mubr.msk.f32.mxu1 %vm1660_vm1, %v1573_v3  ;;  %v1169_v8 = vadd.f32 %v6019_v25, %v1168_v7 }
 0x158   :  { %4784 = vmatmul.mubr.msk.f32.gmra.mrb[56].mxu1 %vm1660_vm1, %v1574_v5  ;;  %v1576_v11 = vmax.f32 %v1174_v6, 0.0 }
 0x159   :  { %v1575_v9 = vmax.f32 %v1169_v8, 0.0  ;;  %v4583_v10 = vpop.f32.mrb[60].mxu0 }
 0x15a   :  { %v1184_v12 = vadd.f32 %v4583_v10, %v6019_v25  ;;  %v1178_v13 = vpop.f32.mrb[61].mxu0 }
 0x15b   :  { %4786 = vmatprep.mubr.msk.f32.mxu1 %vm1660_vm1, %v1575_v9  ;;  %v1179_v14 = vadd.f32 %v6019_v25, %v1178_v13 }
 0x15c   :  { %4787 = vmatmul.mubr.msk.f32.gmra.mrb[58].mxu1 %vm1660_vm1, %v1576_v11  ;;  %v1578_v17 = vmax.f32 %v1184_v12, 0.0 }
 0x15d   :  { %v1577_v15 = vmax.f32 %v1179_v14, 0.0  ;;  %v4586_v16 = vpop.f32.mrb[62].mxu0 }
 0x15e   :  { %v1194_v18 = vadd.f32 %v4586_v16, %v6019_v25  ;;  %v1188_v19 = vpop.f32.mrb[63].mxu0 }
 0x15f   :  { %4789 = vmatprep.mubr.msk.f32.mxu1 %vm1660_vm1, %v1577_v15  ;;  %v1189_v20 = vadd.f32 %v6019_v25, %v1188_v19 }
 0x160   :  { %4790 = vmatmul.mubr.msk.f32.gmra.mrb[60].mxu1 %vm1660_vm1, %v1578_v17  ;;  %v1580_v23 = vmax.f32 %v1194_v18, 0.0 }
 0x161   :  { %v1579_v21 = vmax.f32 %v1189_v20, 0.0  ;;  %v4589_v22 = vpop.f32.mrb[64].mxu0 }
 0x162   :  { %v1204_v24 = vadd.f32 %v4589_v22, %v6019_v25  ;;  %v1198_v26 = vpop.f32.mrb[65].mxu0 }
 0x163   :  { %4792 = vmatprep.mubr.msk.f32.mxu1 %vm1660_vm1, %v1579_v21  ;;  %v1199_v27 = vadd.f32 %v6019_v25, %v1198_v26 }
 0x164   :  { %4793 = vmatmul.mubr.msk.f32.gmra.mrb[62].mxu1 %vm1660_vm1, %v1580_v23  ;;  %v1582_v30 = vmax.f32 %v1204_v24, 0.0 }
 0x165   :  { %v1581_v28 = vmax.f32 %v1199_v27, 0.0  ;;  %v4592_v29 = vpop.f32.mrb[66].mxu0 }
 0x166   :  { %v1214_v31 = vadd.f32 %v4592_v29, %v6019_v25  ;;  %v1208_v32 = vpop.f32.mrb[67].mxu0 }
 0x167   :  { %v1209_v33 = vadd.f32 %v6019_v25, %v1208_v32  ;;  %4795 = vmatprep.mubr.msk.f32.mxu1 %vm1660_vm1, %v1581_v28 }
 0x168   :  { %4796 = vmatmul.mubr.msk.f32.gmra.mrb[64].mxu1 %vm1660_vm1, %v1582_v30  ;;  %v1584_v36 = vmax.f32 %v1214_v31, 0.0 }
 0x169   :  { %v1583_v34 = vmax.f32 %v1209_v33, 0.0  ;;  %v4595_v35 = vpop.f32.mrb[68].mxu0 }
 0x16a   :  { %v1224_v37 = vadd.f32 %v4595_v35, %v6019_v25  ;;  %v1218_v38 = vpop.f32.mrb[69].mxu0 }
 0x16b   :  { %v1219_v39 = vadd.f32 %v6019_v25, %v1218_v38  ;;  %4798 = vmatprep.mubr.msk.f32.mxu1 %vm1660_vm1, %v1583_v34 }
 0x16c   :  { %4799 = vmatmul.mubr.msk.f32.gmra.mrb[66].mxu1 %vm1660_vm1, %v1584_v36  ;;  %v1586_v42 = vmax.f32 %v1224_v37, 0.0 }
 0x16d   :  { %v1585_v40 = vmax.f32 %v1219_v39, 0.0  ;;  %v4598_v41 = vpop.f32.mrb[70].mxu0 }
 0x16e   :  { %v1234_v43 = vadd.f32 %v4598_v41, %v6019_v25  ;;  %v1228_v44 = vpop.f32.mrb[71].mxu0 }
 0x16f   :  { %v1229_v45 = vadd.f32 %v6019_v25, %v1228_v44  ;;  %4801 = vmatprep.mubr.msk.f32.mxu1 %vm1660_vm1, %v1585_v40 }
 0x170   :  { %4802 = vmatmul.mubr.msk.f32.gmra.mrb[68].mxu1 %vm1660_vm1, %v1586_v42  ;;  %v1588_v48 = vmax.f32 %v1234_v43, 0.0 }
 0x171   :  { %v1587_v46 = vmax.f32 %v1229_v45, 0.0  ;;  %v4601_v47 = vpop.f32.mrb[72].mxu0 }
 0x172   :  { %v1244_v49 = vadd.f32 %v4601_v47, %v6019_v25  ;;  %v1238_v50 = vpop.f32.mrb[73].mxu0 }
 0x173   :  { %v1239_v51 = vadd.f32 %v6019_v25, %v1238_v50  ;;  %4804 = vmatprep.mubr.msk.f32.mxu1 %vm1660_vm1, %v1587_v46 }
 0x174   :  { %4805 = vmatmul.mubr.msk.f32.gmra.mrb[70].mxu1 %vm1660_vm1, %v1588_v48  ;;  %v1590_v54 = vmax.f32 %v1244_v49, 0.0 }
 0x175   :  { %v1589_v52 = vmax.f32 %v1239_v51, 0.0  ;;  %v4604_v53 = vpop.f32.mrb[74].mxu0 }
 0x176   :  { %v1254_v55 = vadd.f32 %v4604_v53, %v6019_v25  ;;  %v1248_v56 = vpop.f32.mrb[75].mxu0 }
 0x177   :  { %v1249_v57 = vadd.f32 %v6019_v25, %v1248_v56  ;;  %4807 = vmatprep.mubr.msk.f32.mxu1 %vm1660_vm1, %v1589_v52 }
 0x178   :  { %4808 = vmatmul.mubr.msk.f32.gmra.mrb[72].mxu1 %vm1660_vm1, %v1590_v54  ;;  %v1592_v60 = vmax.f32 %v1254_v55, 0.0 }
 0x179   :  { %v1591_v58 = vmax.f32 %v1249_v57, 0.0  ;;  %v4607_v59 = vpop.f32.mrb[76].mxu0 }
 0x17a   :  { %v1264_v61 = vadd.f32 %v4607_v59, %v6019_v25  ;;  %v1258_v62 = vpop.f32.mrb[77].mxu0 }
 0x17b   :  { %v1259_v63 = vadd.f32 %v6019_v25, %v1258_v62  ;;  %4810 = vmatprep.mubr.msk.f32.mxu1 %vm1660_vm1, %v1591_v58 }
 0x17c   :  { %4811 = vmatmul.mubr.msk.f32.gmra.mrb[74].mxu1 %vm1660_vm1, %v1592_v60  ;;  %v1594_v2 = vmax.f32 %v1264_v61, 0.0 }
 0x17d   :  { %v1593_v0 = vmax.f32 %v1259_v63, 0.0  ;;  %v4610_v1 = vpop.f32.mrb[78].mxu0 }
 0x17e   :  { %v1274_v3 = vadd.f32 %v4610_v1, %v6019_v25  ;;  %v1268_v4 = vpop.f32.mrb[79].mxu0 }
 0x17f   :  { %v1269_v5 = vadd.f32 %v6019_v25, %v1268_v4  ;;  %4813 = vmatprep.mubr.msk.f32.mxu1 %vm1660_vm1, %v1593_v0 }
 0x180   :  { %4814 = vmatmul.mubr.msk.f32.gmra.mrb[76].mxu1 %vm1660_vm1, %v1594_v2  ;;  %v1596_v8 = vmax.f32 %v1274_v3, 0.0 }
 0x181   :  { %v1595_v6 = vmax.f32 %v1269_v5, 0.0  ;;  %v4613_v7 = vpop.f32.mrb[80].mxu0 }
 0x182   :  { %v1284_v9 = vadd.f32 %v4613_v7, %v6019_v25  ;;  %v1278_v10 = vpop.f32.mrb[81].mxu0 }
 0x183   :  { %v1279_v11 = vadd.f32 %v6019_v25, %v1278_v10  ;;  %4816 = vmatprep.mubr.msk.f32.mxu1 %vm1660_vm1, %v1595_v6 }
 0x184   :  { %4817 = vmatmul.mubr.msk.f32.gmra.mrb[78].mxu1 %vm1660_vm1, %v1596_v8  ;;  %v1598_v14 = vmax.f32 %v1284_v9, 0.0 }
 0x185   :  { %v1597_v12 = vmax.f32 %v1279_v11, 0.0  ;;  %v4616_v13 = vpop.f32.mrb[82].mxu0 }
 0x186   :  { %v1294_v15 = vadd.f32 %v4616_v13, %v6019_v25  ;;  %v1288_v16 = vpop.f32.mrb[83].mxu0 }
 0x187   :  { %v1289_v17 = vadd.f32 %v6019_v25, %v1288_v16  ;;  %4819 = vmatprep.mubr.msk.f32.mxu1 %vm1660_vm1, %v1597_v12 }
 0x188   :  { %4820 = vmatmul.mubr.msk.f32.gmra.mrb[80].mxu1 %vm1660_vm1, %v1598_v14  ;;  %v1600_v20 = vmax.f32 %v1294_v15, 0.0 }
 0x189   :  { %v1599_v18 = vmax.f32 %v1289_v17, 0.0  ;;  %v4619_v19 = vpop.f32.mrb[84].mxu0 }
 0x18a   :  { %v1304_v21 = vadd.f32 %v4619_v19, %v6019_v25  ;;  %v1298_v22 = vpop.f32.mrb[85].mxu0 }
 0x18b   :  { %v1299_v23 = vadd.f32 %v6019_v25, %v1298_v22  ;;  %4822 = vmatprep.mubr.msk.f32.mxu1 %vm1660_vm1, %v1599_v18 }
 0x18c   :  { %4823 = vmatmul.mubr.msk.f32.gmra.mrb[82].mxu1 %vm1660_vm1, %v1600_v20  ;;  %v1602_v27 = vmax.f32 %v1304_v21, 0.0 }
 0x18d   :  { %v1601_v24 = vmax.f32 %v1299_v23, 0.0  ;;  %v4622_v26 = vpop.f32.mrb[86].mxu0 }
 0x18e   :  { %v1314_v28 = vadd.f32 %v4622_v26, %v6019_v25  ;;  %v1308_v29 = vpop.f32.mrb[87].mxu0 }
 0x18f   :  { %v1309_v30 = vadd.f32 %v6019_v25, %v1308_v29  ;;  %4825 = vmatprep.mubr.msk.f32.mxu1 %vm1660_vm1, %v1601_v24 }
 0x190   :  { %4826 = vmatmul.mubr.msk.f32.gmra.mrb[84].mxu1 %vm1660_vm1, %v1602_v27  ;;  %v1604_v33 = vmax.f32 %v1314_v28, 0.0  ;;  %v6374_v28 = vld [vmem:[%s6824_s5] ss:$0 sm:$0xff] }
 0x191   :  { %v1603_v31 = vmax.f32 %v1309_v30, 0.0  ;;  %v4625_v32 = vpop.f32.mrb[88].mxu0 }
 0x192   :  { %v1324_v34 = vadd.f32 %v4625_v32, %v6019_v25  ;;  %v1318_v35 = vpop.f32.mrb[89].mxu0  ;;  %v6379_v32 = vld [vmem:[%s6822_s3] ss:$0 sm:$0xff] }
 0x193   :  { %v1319_v36 = vadd.f32 %v6019_v25, %v1318_v35  ;;  %4828 = vmatprep.mubr.msk.f32.mxu1 %vm1660_vm1, %v1603_v31 }
 0x194   :  { %4829 = vmatmul.mubr.msk.f32.gmra.mrb[86].mxu1 %vm1660_vm1, %v1604_v33  ;;  %v1606_v39 = vmax.f32 %v1324_v34, 0.0 }
 0x195   :  { %v1605_v37 = vmax.f32 %v1319_v36, 0.0  ;;  %v4628_v38 = vpop.f32.mrb[90].mxu0 }
 0x196   :  { %v1334_v40 = vadd.f32 %v4628_v38, %v6019_v25  ;;  %v1328_v41 = vpop.f32.mrb[91].mxu0 }
 0x197   :  { %v1329_v42 = vadd.f32 %v6019_v25, %v1328_v41  ;;  %4831 = vmatprep.mubr.msk.f32.mxu1 %vm1660_vm1, %v1605_v37 }
 0x198   :  { %4832 = vmatmul.mubr.msk.f32.gmra.mrb[88].mxu1 %vm1660_vm1, %v1606_v39  ;;  %v1608_v45 = vmax.f32 %v1334_v40, 0.0 }
 0x199   :  { %v1607_v43 = vmax.f32 %v1329_v42, 0.0  ;;  %v4631_v44 = vpop.f32.mrb[92].mxu0 }
 0x19a   :  { %v1344_v46 = vadd.f32 %v4631_v44, %v6019_v25  ;;  %v1338_v47 = vpop.f32.mrb[93].mxu0 }
 0x19b   :  { %v1339_v48 = vadd.f32 %v6019_v25, %v1338_v47  ;;  %4834 = vmatprep.mubr.msk.f32.mxu1 %vm1660_vm1, %v1607_v43 }
 0x19c   :  { %4835 = vmatmul.mubr.msk.f32.gmra.mrb[90].mxu1 %vm1660_vm1, %v1608_v45  ;;  %v1610_v51 = vmax.f32 %v1344_v46, 0.0 }
 0x19d   :  { %v1609_v49 = vmax.f32 %v1339_v48, 0.0  ;;  %v4634_v50 = vpop.f32.mrb[94].mxu0 }
 0x19e   :  { %v1354_v52 = vadd.f32 %v4634_v50, %v6019_v25  ;;  %v1348_v53 = vpop.f32.mrb[95].mxu0 }
 0x19f   :  { %v1349_v54 = vadd.f32 %v6019_v25, %v1348_v53  ;;  %4837 = vmatprep.mubr.msk.f32.mxu1 %vm1660_vm1, %v1609_v49 }
 0x1a0   :  { %4838 = vmatmul.mubr.msk.f32.gmra.mrb[92].mxu1 %vm1660_vm1, %v1610_v51  ;;  %v1612_v57 = vmax.f32 %v1354_v52, 0.0 }
 0x1a1   :  { %v1611_v55 = vmax.f32 %v1349_v54, 0.0  ;;  %v4637_v56 = vpop.f32.mrb[96].mxu0 }
 0x1a2   :  { %v1364_v58 = vadd.f32 %v4637_v56, %v6019_v25  ;;  %v1358_v59 = vpop.f32.mrb[97].mxu0 }
 0x1a3   :  { %v1359_v60 = vadd.f32 %v6019_v25, %v1358_v59  ;;  %4840 = vmatprep.mubr.msk.f32.mxu1 %vm1660_vm1, %v1611_v55 }
 0x1a4   :  { %4841 = vmatmul.mubr.msk.f32.gmra.mrb[94].mxu1 %vm1660_vm1, %v1612_v57  ;;  %v1614_v63 = vmax.f32 %v1364_v58, 0.0 }
 0x1a5   :  { %v1613_v61 = vmax.f32 %v1359_v60, 0.0  ;;  %v4640_v62 = vpop.f32.mrb[98].mxu0 }
 0x1a6   :  { %v1374_v0 = vadd.f32 %v4640_v62, %v6019_v25  ;;  %v1368_v1 = vpop.f32.mrb[99].mxu0 }
 0x1a7   :  { %v1369_v2 = vadd.f32 %v6019_v25, %v1368_v1  ;;  %4843 = vmatprep.mubr.msk.f32.mxu1 %vm1660_vm1, %v1613_v61 }
 0x1a8   :  { %4844 = vmatmul.mubr.msk.f32.gmra.mrb[96].mxu1 %vm1660_vm1, %v1614_v63  ;;  %v1616_v5 = vmax.f32 %v1374_v0, 0.0 }
 0x1a9   :  { %v1615_v3 = vmax.f32 %v1369_v2, 0.0  ;;  %v4643_v4 = vpop.f32.mrb[100].mxu0 }
 0x1aa   :  { %v1384_v6 = vadd.f32 %v4643_v4, %v6019_v25  ;;  %v1378_v7 = vpop.f32.mrb[101].mxu0 }
 0x1ab   :  { %v1379_v8 = vadd.f32 %v6019_v25, %v1378_v7  ;;  %4846 = vmatprep.mubr.msk.f32.mxu1 %vm1660_vm1, %v1615_v3 }
 0x1ac   :  { %4847 = vmatmul.mubr.msk.f32.gmra.mrb[98].mxu1 %vm1660_vm1, %v1616_v5  ;;  %v1618_v11 = vmax.f32 %v1384_v6, 0.0 }
 0x1ad   :  { %v1617_v9 = vmax.f32 %v1379_v8, 0.0  ;;  %v4646_v10 = vpop.f32.mrb[102].mxu0 }
 0x1ae   :  { %v1394_v12 = vadd.f32 %v4646_v10, %v6019_v25  ;;  %v1388_v13 = vpop.f32.mrb[103].mxu0 }
 0x1af   :  { %v1389_v14 = vadd.f32 %v6019_v25, %v1388_v13  ;;  %4849 = vmatprep.mubr.msk.f32.mxu1 %vm1660_vm1, %v1617_v9 }
 0x1b0   :  { %4850 = vmatmul.mubr.msk.f32.gmra.mrb[100].mxu1 %vm1660_vm1, %v1618_v11  ;;  %v1620_v17 = vmax.f32 %v1394_v12, 0.0 }
 0x1b1   :  { %v1619_v15 = vmax.f32 %v1389_v14, 0.0  ;;  %v4649_v16 = vpop.f32.mrb[104].mxu0 }
 0x1b2   :  { %v1404_v18 = vadd.f32 %v4649_v16, %v6019_v25  ;;  %v1398_v19 = vpop.f32.mrb[105].mxu0 }
 0x1b3   :  { %v1399_v20 = vadd.f32 %v6019_v25, %v1398_v19  ;;  %4852 = vmatprep.mubr.msk.f32.mxu1 %vm1660_vm1, %v1619_v15 }
 0x1b4   :  { %4853 = vmatmul.mubr.msk.f32.gmra.mrb[102].mxu1 %vm1660_vm1, %v1620_v17  ;;  %v1622_v23 = vmax.f32 %v1404_v18, 0.0 }
 0x1b5   :  { %v1621_v21 = vmax.f32 %v1399_v20, 0.0  ;;  %v4652_v22 = vpop.f32.mrb[106].mxu0 }
 0x1b6   :  { %v1414_v24 = vadd.f32 %v4652_v22, %v6019_v25  ;;  %v1408_v26 = vpop.f32.mrb[107].mxu0 }
 0x1b7   :  { %v1409_v27 = vadd.f32 %v6019_v25, %v1408_v26  ;;  %4855 = vmatprep.mubr.msk.f32.mxu1 %vm1660_vm1, %v1621_v21 }
 0x1b8   :  { %4856 = vmatmul.mubr.msk.f32.gmra.mrb[104].mxu1 %vm1660_vm1, %v1622_v23  ;;  %v1624_v31 = vmax.f32 %v1414_v24, 0.0 }
 0x1b9   :  { %v1623_v29 = vmax.f32 %v1409_v27, 0.0  ;;  %v4655_v30 = vpop.f32.mrb[108].mxu0 }
 0x1ba   :  { %v1424_v33 = vadd.f32 %v6379_v32, %v4655_v30  ;;  %v1418_v25 = vpop.f32.mrb[109].mxu0 }
 0x1bb   :  { %v4701_v34 = vpop.f32.mrb[0].mxu1  ;;  %v1419_v35 = vadd.f32 %v6379_v32, %v1418_v25  ;;  %4858 = vmatprep.mubr.msk.f32.mxu1 %vm1660_vm1, %v1623_v29 }
 0x1bc   :  { %v2117_v36 = vadd.f32 %v4701_v34, %v6374_v28  ;;  %v2111_v37 = vpop.f32.mrb[1].mxu1  ;;  %4859 = vmatmul.mubr.msk.f32.gmra.mrb[106].mxu1 %vm1660_vm1, %v1624_v31  ;;  %v1626_v42 = vmax.f32 %v1424_v33, 0.0 }
 0x1bd   :  { %v2112_v38 = vadd.f32 %v6374_v28, %v2111_v37  ;;  %v1625_v39 = vmax.f32 %v1419_v35, 0.0  ;;  %v4658_v40 = vpop.f32.mrb[110].mxu0 }
 0x1be   :  { %v2751_v41 = vmax.f32 %v2117_v36, 0.0  ;;  %v1434_v43 = vadd.f32 %v6379_v32, %v4658_v40  ;;  %v1428_v44 = vpop.f32.mrb[111].mxu0 }
 0x1bf   :  { %v2750_v45 = vmax.f32 %v2112_v38, 0.0  ;;  %v4704_v46 = vpop.f32.mrb[2].mxu1  ;;  %v1429_v47 = vadd.f32 %v6379_v32, %v1428_v44  ;;  %4861 = vmatprep.mubr.msk.f32.mxu1 %vm1660_vm1, %v1625_v39 }
 0x1c0   :  { %v2127_v48 = vadd.f32 %v4704_v46, %v6374_v28  ;;  %v2121_v49 = vpop.f32.mrb[3].mxu1  ;;  %4862 = vmatmul.mubr.msk.f32.gmra.mrb[108].mxu1 %vm1660_vm1, %v1626_v42  ;;  %v1628_v55 = vmax.f32 %v1434_v43, 0.0 }
 0x1c1   :  { %v6392_v50 = vpack.c.bf16 %v2751_v41, %v2750_v45  ;;  %v2122_v51 = vadd.f32 %v6374_v28, %v2121_v49  ;;  %v1627_v52 = vmax.f32 %v1429_v47, 0.0  ;;  %v4661_v53 = vpop.f32.mrb[112].mxu0 }
 0x1c2   :  { %v2753_v54 = vmax.f32 %v2127_v48, 0.0  ;;  %v1444_v56 = vadd.f32 %v6379_v32, %v4661_v53  ;;  %v1438_v57 = vpop.f32.mrb[113].mxu0 }
 0x1c3   :  { %v2752_v58 = vmax.f32 %v2122_v51, 0.0  ;;  %v4707_v59 = vpop.f32.mrb[4].mxu1  ;;  %v1439_v60 = vadd.f32 %v6379_v32, %v1438_v57  ;;  %4864 = vmatprep.mubr.msk.f32.mxu1 %vm1660_vm1, %v1627_v52 }
 0x1c4   :  { %v2137_v61 = vadd.f32 %v4707_v59, %v6374_v28  ;;  %v2131_v62 = vpop.f32.mrb[5].mxu1  ;;  %4865 = vmatmul.mubr.msk.f32.gmra.mrb[110].mxu1 %vm1660_vm1, %v1628_v55  ;;  %v1630_v4 = vmax.f32 %v1444_v56, 0.0 }
 0x1c5   :  { %v6400_v63 = vpack.c.bf16 %v2753_v54, %v2752_v58  ;;  %v2132_v0 = vadd.f32 %v6374_v28, %v2131_v62  ;;  %v1629_v1 = vmax.f32 %v1439_v60, 0.0  ;;  %v4664_v2 = vpop.f32.mrb[114].mxu0 }
 0x1c6   :  { %v2755_v3 = vmax.f32 %v2137_v61, 0.0  ;;  %v1454_v5 = vadd.f32 %v6379_v32, %v4664_v2  ;;  %v1448_v6 = vpop.f32.mrb[115].mxu0 }
 0x1c7   :  { %v2754_v7 = vmax.f32 %v2132_v0, 0.0  ;;  %v4710_v8 = vpop.f32.mrb[6].mxu1  ;;  %4867 = vmatprep.mubr.msk.f32.mxu1 %vm1660_vm1, %v1629_v1  ;;  %v1449_v9 = vadd.f32 %v6379_v32, %v1448_v6 }
 0x1c8   :  { %v2147_v10 = vadd.f32 %v4710_v8, %v6374_v28  ;;  %v2141_v11 = vpop.f32.mrb[7].mxu1  ;;  %4868 = vmatmul.mubr.msk.f32.gmra.mrb[112].mxu1 %vm1660_vm1, %v1630_v4  ;;  %v1632_v12 = vmax.f32 %v1454_v5, 0.0 }
 0x1c9   :  { %v6408_v13 = vpack.c.bf16 %v2755_v3, %v2754_v7  ;;  %v2142_v14 = vadd.f32 %v6374_v28, %v2141_v11  ;;  %v1631_v15 = vmax.f32 %v1449_v9, 0.0  ;;  %v4667_v16 = vpop.f32.mrb[116].mxu0 }
 0x1ca   :  { %v2757_v17 = vmax.f32 %v2147_v10, 0.0  ;;  %v1464_v18 = vadd.f32 %v6379_v32, %v4667_v16  ;;  %v1458_v19 = vpop.f32.mrb[117].mxu0 }
 0x1cb   :  { %v2756_v20 = vmax.f32 %v2142_v14, 0.0  ;;  %v4713_v21 = vpop.f32.mrb[8].mxu1  ;;  %4870 = vmatprep.mubr.msk.f32.mxu1 %vm1660_vm1, %v1631_v15  ;;  %v1459_v22 = vadd.f32 %v6379_v32, %v1458_v19 }
 0x1cc   :  { %v2157_v23 = vadd.f32 %v4713_v21, %v6374_v28  ;;  %v2151_v24 = vpop.f32.mrb[9].mxu1  ;;  %4871 = vmatmul.mubr.msk.f32.gmra.mrb[114].mxu1 %vm1660_vm1, %v1632_v12  ;;  %v1634_v26 = vmax.f32 %v1464_v18, 0.0 }
 0x1cd   :  { %v6416_v27 = vpack.c.bf16 %v2757_v17, %v2756_v20  ;;  %v2152_v29 = vadd.f32 %v6374_v28, %v2151_v24  ;;  %v1633_v30 = vmax.f32 %v1459_v22, 0.0  ;;  %v4670_v31 = vpop.f32.mrb[118].mxu0 }
 0x1ce   :  { %v2759_v33 = vmax.f32 %v2157_v23, 0.0  ;;  %v1474_v25 = vadd.f32 %v6379_v32, %v4670_v31  ;;  %v1468_v34 = vpop.f32.mrb[119].mxu0 }
 0x1cf   :  { %v2758_v35 = vmax.f32 %v2152_v29, 0.0  ;;  %v4716_v36 = vpop.f32.mrb[10].mxu1  ;;  %4873 = vmatprep.mubr.msk.f32.mxu1 %vm1660_vm1, %v1633_v30  ;;  %v1469_v37 = vadd.f32 %v6379_v32, %v1468_v34 }
 0x1d0   :  { %v2167_v38 = vadd.f32 %v4716_v36, %v6374_v28  ;;  %v2161_v39 = vpop.f32.mrb[11].mxu1  ;;  %4874 = vmatmul.mubr.msk.f32.gmra.mrb[116].mxu1 %vm1660_vm1, %v1634_v26  ;;  %v1636_v40 = vmax.f32 %v1474_v25, 0.0 }
 0x1d1   :  { %v6424_v41 = vpack.c.bf16 %v2759_v33, %v2758_v35  ;;  %v2162_v42 = vadd.f32 %v6374_v28, %v2161_v39  ;;  %v1635_v43 = vmax.f32 %v1469_v37, 0.0  ;;  %v4673_v44 = vpop.f32.mrb[120].mxu0 }
 0x1d2   :  { %v2761_v45 = vmax.f32 %v2167_v38, 0.0  ;;  %v1484_v46 = vadd.f32 %v6379_v32, %v4673_v44  ;;  %v1478_v47 = vpop.f32.mrb[121].mxu0 }
 0x1d3   :  { %v2760_v48 = vmax.f32 %v2162_v42, 0.0  ;;  %v4719_v49 = vpop.f32.mrb[12].mxu1  ;;  %4876 = vmatprep.mubr.msk.f32.mxu1 %vm1660_vm1, %v1635_v43  ;;  %v1479_v51 = vadd.f32 %v6379_v32, %v1478_v47 }
 0x1d4   :  { %v2177_v52 = vadd.f32 %v4719_v49, %v6374_v28  ;;  %v2171_v53 = vpop.f32.mrb[13].mxu1  ;;  %4877 = vmatmul.mubr.msk.f32.gmra.mrb[118].mxu1 %vm1660_vm1, %v1636_v40  ;;  %v1638_v54 = vmax.f32 %v1484_v46, 0.0 }
 0x1d5   :  { %v6432_v55 = vpack.c.bf16 %v2761_v45, %v2760_v48  ;;  %v2172_v56 = vadd.f32 %v6374_v28, %v2171_v53  ;;  %v1637_v57 = vmax.f32 %v1479_v51, 0.0  ;;  %v4676_v58 = vpop.f32.mrb[122].mxu0 }
 0x1d6   :  { %v2763_v59 = vmax.f32 %v2177_v52, 0.0  ;;  %v1494_v60 = vadd.f32 %v6379_v32, %v4676_v58  ;;  %v1488_v61 = vpop.f32.mrb[123].mxu0 }
 0x1d7   :  { %v2762_v62 = vmax.f32 %v2172_v56, 0.0  ;;  %v4722_v0 = vpop.f32.mrb[14].mxu1  ;;  %4879 = vmatprep.mubr.msk.f32.mxu1 %vm1660_vm1, %v1637_v57  ;;  %v1489_v1 = vadd.f32 %v6379_v32, %v1488_v61 }
 0x1d8   :  { %v2187_v2 = vadd.f32 %v4722_v0, %v6374_v28  ;;  %v2181_v3 = vpop.f32.mrb[15].mxu1  ;;  %4880 = vmatmul.mubr.msk.f32.gmra.mrb[120].mxu1 %vm1660_vm1, %v1638_v54  ;;  %v1640_v4 = vmax.f32 %v1494_v60, 0.0 }
 0x1d9   :  { %v6440_v5 = vpack.c.bf16 %v2763_v59, %v2762_v62  ;;  %v2182_v6 = vadd.f32 %v6374_v28, %v2181_v3  ;;  %v1639_v7 = vmax.f32 %v1489_v1, 0.0  ;;  %v4679_v8 = vpop.f32.mrb[124].mxu0 }
 0x1da   :  { %v2765_v9 = vmax.f32 %v2187_v2, 0.0  ;;  %v1504_v10 = vadd.f32 %v6379_v32, %v4679_v8  ;;  %v1498_v11 = vpop.f32.mrb[125].mxu0 }
 0x1db   :  { %v2764_v12 = vmax.f32 %v2182_v6, 0.0  ;;  %v4725_v14 = vpop.f32.mrb[16].mxu1  ;;  %4882 = vmatprep.mubr.msk.f32.mxu1 %vm1660_vm1, %v1639_v7  ;;  %v1499_v15 = vadd.f32 %v6379_v32, %v1498_v11 }
 0x1dc   :  { %v2197_v16 = vadd.f32 %v4725_v14, %v6374_v28  ;;  %v2191_v17 = vpop.f32.mrb[17].mxu1  ;;  %4883 = vmatmul.mubr.msk.f32.gmra.mrb[122].mxu1 %vm1660_vm1, %v1640_v4  ;;  %v1642_v18 = vmax.f32 %v1504_v10, 0.0 }
 0x1dd   :  { %v6448_v19 = vpack.c.bf16 %v2765_v9, %v2764_v12  ;;  %v2192_v20 = vadd.f32 %v6374_v28, %v2191_v17  ;;  %v1641_v21 = vmax.f32 %v1499_v15, 0.0  ;;  %v4682_v22 = vpop.f32.mrb[126].mxu0 }
 0x1de   :  { %v2767_v23 = vmax.f32 %v2197_v16, 0.0  ;;  %v1514_v24 = vadd.f32 %v6379_v32, %v4682_v22  ;;  %v1508_v26 = vpop.f32.mrb[127].mxu0 }
 0x1df   :  { %v2766_v29 = vmax.f32 %v2192_v20, 0.0  ;;  %v4728_v30 = vpop.f32.mrb[18].mxu1  ;;  %4885 = vmatprep.mubr.msk.f32.mxu1 %vm1660_vm1, %v1641_v21  ;;  %v1509_v31 = vadd.f32 %v6379_v32, %v1508_v26  ;;  %v6466_v32 = vld [vmem:[%s6825_s6] sm:$0x1] }
 0x1e0   :  { %v2207_v33 = vadd.f32 %v4728_v30, %v6374_v28  ;;  %v2201_v25 = vpop.f32.mrb[19].mxu1  ;;  %4886 = vmatmul.mubr.msk.f32.gmra.mrb[124].mxu1 %vm1660_vm1, %v1642_v18  ;;  %v1644_v35 = vmax.f32 %v1514_v24, 0.0  ;;  %4379 = vmatprep.mubr.msk.f32.mxu0 %vm1660_vm1, %v6466_v32 }
 0x1e1   :  { %v4915_v36 = vpack.c.bf16 %v2767_v23, %v2766_v29  ;;  %v2202_v37 = vadd.f32 %v6374_v28, %v2201_v25  ;;  %v1643_v38 = vmax.f32 %v1509_v31, 0.0 }
 0x1e2   :  { %v2769_v39 = vmax.f32 %v2207_v33, 0.0 }
 0x1e3   :  { %v2768_v40 = vmax.f32 %v2202_v37, 0.0  ;;  %v4731_v42 = vpop.f32.mrb[20].mxu1  ;;  %4917 = vmatprep.subr.msk.bf16.mxu0 %vm6457_vm2, %v4915_v36  ;;  %4888 = vmatprep.mubr.msk.f32.mxu1 %vm1660_vm1, %v1643_v38 }
 0x1e4   :  { %v2217_v43 = vadd.f32 %v4731_v42, %v6374_v28  ;;  %v2211_v44 = vpop.f32.mrb[21].mxu1  ;;  %4920 = vmatpush3.bf16.xpose.msk.msra.mxu0 %vm6457_vm2, %v6392_v50  ;;  %4889 = vmatmul.mubr.msk.f32.gmra.mrb[126].mxu1 %vm1660_vm1, %v1644_v35 }
 0x1e5   :  { %v4921_v45 = vpack.c.bf16 %v2769_v39, %v2768_v40  ;;  %v2212_v46 = vadd.f32 %v6374_v28, %v2211_v44  ;;  %4413 = vmatprep.mubr.msk.f32.mxu1 %vm1660_vm1, %v6466_v32 }
 0x1e6   :  { %v2771_v47 = vmax.f32 %v2217_v43, 0.0 }
 0x1e7   :  { %v2770_v48 = vmax.f32 %v2212_v46, 0.0  ;;  %v4734_v49 = vpop.f32.mrb[22].mxu1  ;;  %4923 = vmatprep.subr.msk.bf16.mxu0 %vm6457_vm2, %v4921_v45 }
 0x1e8   :  { %v2227_v51 = vadd.f32 %v4734_v49, %v6374_v28  ;;  %v2221_v50 = vpop.f32.mrb[23].mxu1 }
 0x1e9   :  { %v4927_v52 = vpack.c.bf16 %v2771_v47, %v2770_v48  ;;  %v2222_v53 = vadd.f32 %v6374_v28, %v2221_v50 }
 0x1ea   :  { %v2773_v54 = vmax.f32 %v2227_v51, 0.0 }
 0x1eb   :  { %v2772_v56 = vmax.f32 %v2222_v53, 0.0  ;;  %v4737_v57 = vpop.f32.mrb[24].mxu1 }
 0x1ec   :  { %v2237_v58 = vadd.f32 %v4737_v57, %v6374_v28  ;;  %v2231_v59 = vpop.f32.mrb[25].mxu1  ;;  %4926 = vmatpush3.bf16.xpose.msk.msra.mxu0 %vm6457_vm2, %v6400_v63 }
 0x1ed   :  { %v4933_v60 = vpack.c.bf16 %v2773_v54, %v2772_v56  ;;  %v2232_v61 = vadd.f32 %v6374_v28, %v2231_v59  ;;  %4929 = vmatprep.subr.msk.bf16.mxu0 %vm6457_vm2, %v4927_v52 }
 0x1ee   :  { %v2775_v62 = vmax.f32 %v2237_v58, 0.0 }
 0x1ef   :  { %v2774_v0 = vmax.f32 %v2232_v61, 0.0  ;;  %v4740_v1 = vpop.f32.mrb[26].mxu1 }
 0x1f0   :  { %v2247_v2 = vadd.f32 %v4740_v1, %v6374_v28  ;;  %v2241_v3 = vpop.f32.mrb[27].mxu1 }
 0x1f1   :  { %v4939_v4 = vpack.c.bf16 %v2775_v62, %v2774_v0  ;;  %v2242_v6 = vadd.f32 %v6374_v28, %v2241_v3 }
 0x1f2   :  { %v2777_v7 = vmax.f32 %v2247_v2, 0.0 }
 0x1f3   :  { %v2776_v8 = vmax.f32 %v2242_v6, 0.0  ;;  %v4743_v9 = vpop.f32.mrb[28].mxu1 }
 0x1f4   :  { %v2257_v63 = vadd.f32 %v4743_v9, %v6374_v28  ;;  %v2251_v10 = vpop.f32.mrb[29].mxu1  ;;  %4932 = vmatpush3.bf16.xpose.msk.msra.mxu0 %vm6457_vm2, %v6408_v13 }
 0x1f5   :  { %v4945_v11 = vpack.c.bf16 %v2777_v7, %v2776_v8  ;;  %v2252_v12 = vadd.f32 %v6374_v28, %v2251_v10  ;;  %4935 = vmatprep.subr.msk.bf16.mxu0 %vm6457_vm2, %v4933_v60 }
 0x1f6   :  { %v2779_v14 = vmax.f32 %v2257_v63, 0.0 }
 0x1f7   :  { %v2778_v15 = vmax.f32 %v2252_v12, 0.0  ;;  %v4746_v16 = vpop.f32.mrb[30].mxu1 }
 0x1f8   :  { %v2267_v17 = vadd.f32 %v4746_v16, %v6374_v28  ;;  %v2261_v18 = vpop.f32.mrb[31].mxu1 }
 0x1f9   :  { %v4951_v20 = vpack.c.bf16 %v2779_v14, %v2778_v15  ;;  %v2262_v21 = vadd.f32 %v6374_v28, %v2261_v18 }
 0x1fa   :  { %v2781_v22 = vmax.f32 %v2267_v17, 0.0 }
 0x1fb   :  { %v2780_v23 = vmax.f32 %v2262_v21, 0.0  ;;  %v4749_v24 = vpop.f32.mrb[32].mxu1 }
 0x1fc   :  { %v2277_v13 = vadd.f32 %v4749_v24, %v6374_v28  ;;  %v2271_v26 = vpop.f32.mrb[33].mxu1  ;;  %4938 = vmatpush3.bf16.xpose.msk.msra.mxu0 %vm6457_vm2, %v6416_v27 }
 0x1fd   :  { %v4957_v29 = vpack.c.bf16 %v2781_v22, %v2780_v23  ;;  %v2272_v30 = vadd.f32 %v6374_v28, %v2271_v26  ;;  %4941 = vmatprep.subr.msk.bf16.mxu0 %vm6457_vm2, %v4939_v4 }
 0x1fe   :  { %v2783_v31 = vmax.f32 %v2277_v13, 0.0 }
 0x1ff   :  { %v2782_v33 = vmax.f32 %v2272_v30, 0.0  ;;  %v4752_v25 = vpop.f32.mrb[34].mxu1 }
 0x200   :  { %v2287_v35 = vadd.f32 %v4752_v25, %v6374_v28  ;;  %v2281_v36 = vpop.f32.mrb[35].mxu1 }
 0x201   :  { %v6511_v37 = vpack.c.bf16 %v2783_v31, %v2782_v33  ;;  %v2282_v38 = vadd.f32 %v6374_v28, %v2281_v36 }
 0x202   :  { %v2785_v39 = vmax.f32 %v2287_v35, 0.0 }
 0x203   :  { %v2784_v40 = vmax.f32 %v2282_v38, 0.0  ;;  %v4755_v42 = vpop.f32.mrb[36].mxu1 }
 0x204   :  { %v2297_v27 = vadd.f32 %v4755_v42, %v6374_v28  ;;  %v2291_v43 = vpop.f32.mrb[37].mxu1  ;;  %4944 = vmatpush3.bf16.xpose.msk.msra.mxu0 %vm6457_vm2, %v6424_v41 }
 0x205   :  { %v6518_v44 = vpack.c.bf16 %v2785_v39, %v2784_v40  ;;  %v2292_v45 = vadd.f32 %v6374_v28, %v2291_v43  ;;  %4947 = vmatprep.subr.msk.bf16.mxu0 %vm6457_vm2, %v4945_v11 }
 0x206   :  { %v2787_v46 = vmax.f32 %v2297_v27, 0.0 }
 0x207   :  { %v2786_v47 = vmax.f32 %v2292_v45, 0.0  ;;  %v4758_v48 = vpop.f32.mrb[38].mxu1 }
 0x208   :  { %v2307_v49 = vadd.f32 %v4758_v48, %v6374_v28  ;;  %v2301_v51 = vpop.f32.mrb[39].mxu1 }
 0x209   :  { %v6524_v50 = vpack.c.bf16 %v2787_v46, %v2786_v47  ;;  %v2302_v52 = vadd.f32 %v6374_v28, %v2301_v51 }
 0x20a   :  { %v2789_v53 = vmax.f32 %v2307_v49, 0.0 }
 0x20b   :  { %v2788_v54 = vmax.f32 %v2302_v52, 0.0  ;;  %v4761_v41 = vpop.f32.mrb[40].mxu1 }
 0x20c   :  { %v2317_v56 = vadd.f32 %v4761_v41, %v6374_v28  ;;  %v2311_v57 = vpop.f32.mrb[41].mxu1  ;;  %4950 = vmatpush3.bf16.xpose.msk.msra.mxu0 %vm6457_vm2, %v6432_v55 }
 0x20d   :  { %v6531_v58 = vpack.c.bf16 %v2789_v53, %v2788_v54  ;;  %v2312_v59 = vadd.f32 %v6374_v28, %v2311_v57  ;;  %4953 = vmatprep.subr.msk.bf16.mxu0 %vm6457_vm2, %v4951_v20 }
 0x20e   :  { %v2791_v60 = vmax.f32 %v2317_v56, 0.0 }
 0x20f   :  { %v2790_v61 = vmax.f32 %v2312_v59, 0.0  ;;  %v4764_v62 = vpop.f32.mrb[42].mxu1 }
 0x210   :  { %v2327_v0 = vadd.f32 %v4764_v62, %v6374_v28  ;;  %v2321_v1 = vpop.f32.mrb[43].mxu1 }
 0x211   :  { %v6537_v2 = vpack.c.bf16 %v2791_v60, %v2790_v61  ;;  %v2322_v3 = vadd.f32 %v6374_v28, %v2321_v1 }
 0x212   :  { %v2793_v4 = vmax.f32 %v2327_v0, 0.0 }
 0x213   :  { %v2792_v6 = vmax.f32 %v2322_v3, 0.0  ;;  %v4767_v55 = vpop.f32.mrb[44].mxu1 }
 0x214   :  { %v2337_v7 = vadd.f32 %v4767_v55, %v6374_v28  ;;  %v2331_v8 = vpop.f32.mrb[45].mxu1  ;;  %4956 = vmatpush3.bf16.xpose.msk.msra.mxu0 %vm6457_vm2, %v6440_v5 }
 0x215   :  { %v6544_v9 = vpack.c.bf16 %v2793_v4, %v2792_v6  ;;  %v2332_v63 = vadd.f32 %v6374_v28, %v2331_v8  ;;  %4959 = vmatprep.subr.msk.bf16.mxu0 %vm6457_vm2, %v4957_v29 }
 0x216   :  { %v2795_v10 = vmax.f32 %v2337_v7, 0.0 }
 0x217   :  { %v2794_v11 = vmax.f32 %v2332_v63, 0.0  ;;  %v4770_v12 = vpop.f32.mrb[46].mxu1 }
 0x218   :  { %v2347_v14 = vadd.f32 %v4770_v12, %v6374_v28  ;;  %v2341_v15 = vpop.f32.mrb[47].mxu1 }
 0x219   :  { %v6550_v16 = vpack.c.bf16 %v2795_v10, %v2794_v11  ;;  %v2342_v17 = vadd.f32 %v6374_v28, %v2341_v15 }
 0x21a   :  { %v2797_v18 = vmax.f32 %v2347_v14, 0.0 }
 0x21b   :  { %v2796_v20 = vmax.f32 %v2342_v17, 0.0  ;;  %v4773_v5 = vpop.f32.mrb[48].mxu1 }
 0x21c   :  { %v2357_v21 = vadd.f32 %v4773_v5, %v6374_v28  ;;  %v2351_v22 = vpop.f32.mrb[49].mxu1  ;;  %4962 = vmatpush3.bf16.xpose.msk.msra.mxu0 %vm6457_vm2, %v6448_v19 }
 0x21d   :  { %v6557_v23 = vpack.c.bf16 %v2797_v18, %v2796_v20  ;;  %v2352_v24 = vadd.f32 %v6374_v28, %v2351_v22 }
 0x21e   :  { %v2799_v13 = vmax.f32 %v2357_v21, 0.0 }
 0x21f   :  { %v2798_v26 = vmax.f32 %v2352_v24, 0.0  ;;  %v4776_v29 = vpop.f32.mrb[50].mxu1 }
 0x220   :  { %v2367_v30 = vadd.f32 %v4776_v29, %v6374_v28  ;;  %v2361_v31 = vpop.f32.mrb[51].mxu1 }
 0x221   :  { %v4963_v33 = vpack.c.bf16 %v2799_v13, %v2798_v26  ;;  %v2362_v25 = vadd.f32 %v6374_v28, %v2361_v31 }
 0x222   :  { %v2801_v35 = vmax.f32 %v2367_v30, 0.0 }
 0x223   :  { %4965 = vmatprep.subr.msk.bf16.mxu1 %vm6457_vm2, %v4963_v33  ;;  %v2800_v36 = vmax.f32 %v2362_v25, 0.0  ;;  %v4779_v38 = vpop.f32.mrb[52].mxu1  ;;  %4380 = vmatmul.mubr.msk.f32.vlgmr.msra.gmra.mrb[128].mxu0 %vm1660_vm1, %v6466_v32 }
 0x224   :  { %4968 = vmatpush3.bf16.xpose.msk.msra.mxu1 %vm6457_vm2, %v6511_v37  ;;  %v2377_v19 = vadd.f32 %v4779_v38, %v6374_v28  ;;  %v2371_v39 = vpop.f32.mrb[53].mxu1  ;;  %4447 = vmatprep.mubr.msk.f32.mxu0 %vm1660_vm1, %v6466_v32 }
 0x225   :  { %v4969_v40 = vpack.c.bf16 %v2801_v35, %v2800_v36  ;;  %v2372_v42 = vadd.f32 %v6374_v28, %v2371_v39 }
 0x226   :  { %v2803_v27 = vmax.f32 %v2377_v19, 0.0 }
 0x227   :  { %4971 = vmatprep.subr.msk.bf16.mxu1 %vm6457_vm2, %v4969_v40  ;;  %v2802_v43 = vmax.f32 %v2372_v42, 0.0  ;;  %v4782_v45 = vpop.f32.mrb[54].mxu1 }
 0x228   :  { %v2387_v46 = vadd.f32 %v4782_v45, %v6374_v28  ;;  %v2381_v47 = vpop.f32.mrb[55].mxu1 }
 0x229   :  { %v4975_v48 = vpack.c.bf16 %v2803_v27, %v2802_v43  ;;  %v2382_v37 = vadd.f32 %v6374_v28, %v2381_v47 }
 0x22a   :  { %v2805_v49 = vmax.f32 %v2387_v46, 0.0 }
 0x22b   :  { %v2804_v51 = vmax.f32 %v2382_v37, 0.0  ;;  %v4785_v52 = vpop.f32.mrb[56].mxu1 }
 0x22c   :  { %4974 = vmatpush3.bf16.xpose.msk.msra.mxu1 %vm6457_vm2, %v6518_v44  ;;  %v2397_v53 = vadd.f32 %v4785_v52, %v6374_v28  ;;  %v2391_v54 = vpop.f32.mrb[57].mxu1 }
 0x22d   :  { %4977 = vmatprep.subr.msk.bf16.mxu1 %vm6457_vm2, %v4975_v48  ;;  %v4981_v41 = vpack.c.bf16 %v2805_v49, %v2804_v51  ;;  %v2392_v56 = vadd.f32 %v6374_v28, %v2391_v54 }
 0x22e   :  { %v2807_v57 = vmax.f32 %v2397_v53, 0.0 }
 0x22f   :  { %v2806_v59 = vmax.f32 %v2392_v56, 0.0  ;;  %v4788_v60 = vpop.f32.mrb[58].mxu1 }
 0x230   :  { %v2407_v61 = vadd.f32 %v4788_v60, %v6374_v28  ;;  %v2401_v62 = vpop.f32.mrb[59].mxu1 }
 0x231   :  { %v4987_v0 = vpack.c.bf16 %v2807_v57, %v2806_v59  ;;  %v2402_v1 = vadd.f32 %v6374_v28, %v2401_v62 }
 0x232   :  { %v2809_v3 = vmax.f32 %v2407_v61, 0.0 }
 0x233   :  { %v2808_v44 = vmax.f32 %v2402_v1, 0.0  ;;  %v4791_v4 = vpop.f32.mrb[60].mxu1 }
 0x234   :  { %4980 = vmatpush3.bf16.xpose.msk.msra.mxu1 %vm6457_vm2, %v6524_v50  ;;  %v2417_v6 = vadd.f32 %v4791_v4, %v6374_v28  ;;  %v2411_v55 = vpop.f32.mrb[61].mxu1 }
 0x235   :  { %4983 = vmatprep.subr.msk.bf16.mxu1 %vm6457_vm2, %v4981_v41  ;;  %v4993_v7 = vpack.c.bf16 %v2809_v3, %v2808_v44  ;;  %v2412_v8 = vadd.f32 %v6374_v28, %v2411_v55 }
 0x236   :  { %v2811_v63 = vmax.f32 %v2417_v6, 0.0 }
 0x237   :  { %v2810_v10 = vmax.f32 %v2412_v8, 0.0  ;;  %v4794_v11 = vpop.f32.mrb[62].mxu1 }
 0x238   :  { %v2427_v12 = vadd.f32 %v4794_v11, %v6374_v28  ;;  %v2421_v14 = vpop.f32.mrb[63].mxu1 }
 0x239   :  { %v4999_v15 = vpack.c.bf16 %v2811_v63, %v2810_v10  ;;  %v2422_v17 = vadd.f32 %v6374_v28, %v2421_v14 }
 0x23a   :  { %v2813_v18 = vmax.f32 %v2427_v12, 0.0 }
 0x23b   :  { %v2812_v50 = vmax.f32 %v2422_v17, 0.0  ;;  %v4797_v20 = vpop.f32.mrb[64].mxu1 }
 0x23c   :  { %4986 = vmatpush3.bf16.xpose.msk.msra.mxu1 %vm6457_vm2, %v6531_v58  ;;  %v2437_v5 = vadd.f32 %v4797_v20, %v6374_v28  ;;  %v2431_v21 = vpop.f32.mrb[65].mxu1 }
 0x23d   :  { %4989 = vmatprep.subr.msk.bf16.mxu1 %vm6457_vm2, %v4987_v0  ;;  %v5005_v22 = vpack.c.bf16 %v2813_v18, %v2812_v50  ;;  %v2432_v24 = vadd.f32 %v6374_v28, %v2431_v21 }
 0x23e   :  { %v2815_v13 = vmax.f32 %v2437_v5, 0.0 }
 0x23f   :  { %v2814_v26 = vmax.f32 %v2432_v24, 0.0  ;;  %v4800_v29 = vpop.f32.mrb[66].mxu1 }
 0x240   :  { %v2447_v30 = vadd.f32 %v4800_v29, %v6374_v28  ;;  %v2441_v31 = vpop.f32.mrb[67].mxu1 }
 0x241   :  { %v6603_v33 = vpack.c.bf16 %v2815_v13, %v2814_v26  ;;  %v2442_v25 = vadd.f32 %v6374_v28, %v2441_v31 }
 0x242   :  { %v2817_v58 = vmax.f32 %v2447_v30, 0.0 }
 0x243   :  { %v2816_v35 = vmax.f32 %v2442_v25, 0.0  ;;  %v4803_v36 = vpop.f32.mrb[68].mxu1  ;;  %v2879_v25 = vld [vmem:[#allocation2] sm:$0x1] }
 0x244   :  { %4992 = vmatpush3.bf16.xpose.msk.msra.mxu1 %vm6457_vm2, %v6537_v2  ;;  %v2457_v38 = vadd.f32 %v4803_v36, %v6374_v28  ;;  %v2451_v19 = vpop.f32.mrb[69].mxu1 }
 0x245   :  { %4995 = vmatprep.subr.msk.bf16.mxu1 %vm6457_vm2, %v4993_v7  ;;  %v6612_v39 = vpack.c.bf16 %v2817_v58, %v2816_v35  ;;  %v2452_v40 = vadd.f32 %v6374_v28, %v2451_v19  ;;  %v5169_v19 = vmov 0  }
 0x246   :  { %v2819_v42 = vmax.f32 %v2457_v38, 0.0  ;;  %5110 = vset.pattern.permute.xlu0 %v5169_v19 }
 0x247   :  { %v2818_v27 = vmax.f32 %v2452_v40, 0.0  ;;  %v4806_v43 = vpop.f32.mrb[70].mxu1  ;;  %2882 = vperm.xlu0 %5110, %v2879_v25  }
 0x248   :  { %v2467_v45 = vadd.f32 %v4806_v43, %v6374_v28  ;;  %v2461_v46 = vpop.f32.mrb[71].mxu1 }
 0x249   :  { %v6616_v47 = vpack.c.bf16 %v2819_v42, %v2818_v27  ;;  %v2462_v2 = vadd.f32 %v6374_v28, %v2461_v46 }
 0x24a   :  { %v2821_v48 = vmax.f32 %v2467_v45, 0.0 }
 0x24b   :  { %v2820_v37 = vmax.f32 %v2462_v2, 0.0  ;;  %v4809_v49 = vpop.f32.mrb[72].mxu1 }
 0x24c   :  { %4998 = vmatpush3.bf16.xpose.msk.msra.mxu1 %vm6457_vm2, %v6544_v9  ;;  %v2477_v51 = vadd.f32 %v4809_v49, %v6374_v28  ;;  %v2471_v52 = vpop.f32.mrb[73].mxu1 }
 0x24d   :  { %5001 = vmatprep.subr.msk.bf16.mxu1 %vm6457_vm2, %v4999_v15  ;;  %v6625_v53 = vpack.c.bf16 %v2821_v48, %v2820_v37  ;;  %v2472_v54 = vadd.f32 %v6374_v28, %v2471_v52 }
 0x24e   :  { %v2823_v41 = vmax.f32 %v2477_v51, 0.0 }
 0x24f   :  { %v2822_v56 = vmax.f32 %v2472_v54, 0.0  ;;  %v4812_v57 = vpop.f32.mrb[74].mxu1 }
 0x250   :  { %v2487_v59 = vadd.f32 %v4812_v57, %v6374_v28  ;;  %v2481_v60 = vpop.f32.mrb[75].mxu1 }
 0x251   :  { %v6629_v61 = vpack.c.bf16 %v2823_v41, %v2822_v56  ;;  %v2482_v9 = vadd.f32 %v6374_v28, %v2481_v60 }
 0x252   :  { %v2825_v62 = vmax.f32 %v2487_v59, 0.0 }
 0x253   :  { %v2824_v0 = vmax.f32 %v2482_v9, 0.0  ;;  %v4815_v1 = vpop.f32.mrb[76].mxu1 }
 0x254   :  { %5004 = vmatpush3.bf16.xpose.msk.msra.mxu1 %vm6457_vm2, %v6550_v16  ;;  %v2497_v3 = vadd.f32 %v4815_v1, %v6374_v28  ;;  %v2491_v44 = vpop.f32.mrb[77].mxu1 }
 0x255   :  { %5007 = vmatprep.subr.msk.bf16.mxu1 %vm6457_vm2, %v5005_v22  ;;  %v6638_v4 = vpack.c.bf16 %v2825_v62, %v2824_v0  ;;  %v2492_v6 = vadd.f32 %v6374_v28, %v2491_v44 }
 0x256   :  { %v2827_v55 = vmax.f32 %v2497_v3, 0.0 }
 0x257   :  { %v2826_v7 = vmax.f32 %v2492_v6, 0.0  ;;  %v4818_v8 = vpop.f32.mrb[78].mxu1 }
 0x258   :  { %v2507_v63 = vadd.f32 %v4818_v8, %v6374_v28  ;;  %v2501_v10 = vpop.f32.mrb[79].mxu1 }
 0x259   :  { %v6642_v11 = vpack.c.bf16 %v2827_v55, %v2826_v7  ;;  %v2502_v16 = vadd.f32 %v6374_v28, %v2501_v10 }
 0x25a   :  { %v2829_v12 = vmax.f32 %v2507_v63, 0.0 }
 0x25b   :  { %v2828_v14 = vmax.f32 %v2502_v16, 0.0  ;;  %v4821_v15 = vpop.f32.mrb[80].mxu1 }
 0x25c   :  { %5010 = vmatpush3.bf16.xpose.msk.msra.mxu1 %vm6457_vm2, %v6557_v23  ;;  %v2517_v17 = vadd.f32 %v4821_v15, %v6374_v28  ;;  %v2511_v18 = vpop.f32.mrb[81].mxu1 }
 0x25d   :  { %v6649_v50 = vpack.c.bf16 %v2829_v12, %v2828_v14  ;;  %v2512_v20 = vadd.f32 %v6374_v28, %v2511_v18 }
 0x25e   :  { %v2831_v5 = vmax.f32 %v2517_v17, 0.0 }
 0x25f   :  { %v2830_v21 = vmax.f32 %v2512_v20, 0.0  ;;  %v4824_v22 = vpop.f32.mrb[82].mxu1 }
 0x260   :  { %v2527_v24 = vadd.f32 %v4824_v22, %v6374_v28  ;;  %v2521_v13 = vpop.f32.mrb[83].mxu1 }
 0x261   :  { %v5011_v26 = vpack.c.bf16 %v2831_v5, %v2830_v21  ;;  %v2522_v29 = vadd.f32 %v6374_v28, %v2521_v13 }
 0x262   :  { %v2833_v30 = vmax.f32 %v2527_v24, 0.0 }
 0x263   :  { %5013 = vmatprep.subr.msk.bf16.mxu0 %vm6457_vm2, %v5011_v26  ;;  %v2832_v23 = vmax.f32 %v2522_v29, 0.0  ;;  %v4827_v31 = vpop.f32.mrb[84].mxu1  ;;  %4414 = vmatmul.mubr.msk.f32.vlgmr.msra.gmra.mrb[128].mxu1 %vm1660_vm1, %v6466_v32 }
 0x264   :  { %5016 = vmatpush3.bf16.xpose.msk.msra.mxu0 %vm6457_vm2, %v6603_v33  ;;  %v2537_v58 = vadd.f32 %v4827_v31, %v6374_v28  ;;  %v2531_v35 = vpop.f32.mrb[85].mxu1  ;;  %4481 = vmatprep.mubr.msk.f32.mxu1 %vm1660_vm1, %v6466_v32 }
 0x265   :  { %v5017_v36 = vpack.c.bf16 %v2833_v30, %v2832_v23  ;;  %v2532_v38 = vadd.f32 %v6374_v28, %v2531_v35 }
 0x266   :  { %v2835_v40 = vmax.f32 %v2537_v58, 0.0 }
 0x267   :  { %5019 = vmatprep.subr.msk.bf16.mxu0 %vm6457_vm2, %v5017_v36  ;;  %v2834_v42 = vmax.f32 %v2532_v38, 0.0  ;;  %v4830_v27 = vpop.f32.mrb[86].mxu1 }
 0x268   :  { %v2547_v33 = vadd.f32 %v4830_v27, %v6374_v28  ;;  %v2541_v43 = vpop.f32.mrb[87].mxu1 }
 0x269   :  { %v5023_v45 = vpack.c.bf16 %v2835_v40, %v2834_v42  ;;  %v2542_v46 = vadd.f32 %v6374_v28, %v2541_v43 }
 0x26a   :  { %v2837_v2 = vmax.f32 %v2547_v33, 0.0 }
 0x26b   :  { %v2836_v48 = vmax.f32 %v2542_v46, 0.0  ;;  %v4833_v37 = vpop.f32.mrb[88].mxu1 }
 0x26c   :  { %5022 = vmatpush3.bf16.xpose.msk.msra.mxu0 %vm6457_vm2, %v6612_v39  ;;  %v2557_v49 = vadd.f32 %v4833_v37, %v6374_v28  ;;  %v2551_v51 = vpop.f32.mrb[89].mxu1 }
 0x26d   :  { %5025 = vmatprep.subr.msk.bf16.mxu0 %vm6457_vm2, %v5023_v45  ;;  %v5029_v52 = vpack.c.bf16 %v2837_v2, %v2836_v48  ;;  %v2552_v54 = vadd.f32 %v6374_v28, %v2551_v51 }
 0x26e   :  { %v2839_v41 = vmax.f32 %v2557_v49, 0.0 }
 0x26f   :  { %v2838_v56 = vmax.f32 %v2552_v54, 0.0  ;;  %v4836_v57 = vpop.f32.mrb[90].mxu1 }
 0x270   :  { %v2567_v59 = vadd.f32 %v4836_v57, %v6374_v28  ;;  %v2561_v60 = vpop.f32.mrb[91].mxu1 }
 0x271   :  { %v5035_v9 = vpack.c.bf16 %v2839_v41, %v2838_v56  ;;  %v2562_v62 = vadd.f32 %v6374_v28, %v2561_v60  ;;  %v6723_v56 = vld [vmem:[%s6824_s5] ss:$0 sm:$0xff]  ;;  %s5171_s5 = smov [#allocation3]  }
 0x272   :  { %v2841_v0 = vmax.f32 %v2567_v59, 0.0  ;;  %s3673_s30 = sshll.u32 %s5171_s5, 4  ;;  %s3674_s30 = int_to_ptr.vmem [resolvable:$true] %s3673_s30 }
 0x273   :  { %v2840_v39 = vmax.f32 %v2562_v62, 0.0  ;;  %v4839_v1 = vpop.f32.mrb[92].mxu1  ;;  %s5145_s4 = scalar_lea.vmem %s3674_s30, 128  ;;  %p5150_p1 = scmp.lt.s32.totalorder %s3674_s30, %s3674_s30 }
 0x274   :  { %5028 = vmatpush3.bf16.xpose.msk.msra.mxu0 %vm6457_vm2, %v6616_v47  ;;  %v2577_v3 = vadd.f32 %v4839_v1, %v6374_v28  ;;  %v2571_v44 = vpop.f32.mrb[93].mxu1  ;;  %p5146_p0 = scmp.ne.s32.totalorder %s3674_s30, %s5145_s4  ;;  %p5151_p2 = scmp.lt.s32.totalorder %s5145_s4, %s5145_s4 }
 0x275   :  { %5031 = vmatprep.subr.msk.bf16.mxu0 %vm6457_vm2, %v5029_v52  ;;  %v5041_v6 = vpack.c.bf16 %v2841_v0, %v2840_v39  ;;  %v2572_v55 = vadd.f32 %v6374_v28, %v2571_v44 }
 0x276   :  { %v2843_v7 = vmax.f32 %v2577_v3, 0.0  ;;  %p5152_p3 = por %p5151_p2, %p5150_p1 }
 0x277   :  { %v2842_v8 = vmax.f32 %v2572_v55, 0.0  ;;  %v4842_v63 = vpop.f32.mrb[94].mxu1 }
 0x278   :  { %v2587_v10 = vadd.f32 %v4842_v63, %v6374_v28  ;;  %v2581_v16 = vpop.f32.mrb[95].mxu1  ;;  %p5153_p4 = pnand %p5152_p3, %p5146_p0 }
 0x279   :  { %v5047_v12 = vpack.c.bf16 %v2843_v7, %v2842_v8  ;;  %v2582_v14 = vadd.f32 %v6374_v28, %v2581_v16 }
 0x27a   :  { %v2845_v15 = vmax.f32 %v2587_v10, 0.0 }
 0x27b   :  { %v2844_v47 = vmax.f32 %v2582_v14, 0.0  ;;  %v4845_v17 = vpop.f32.mrb[96].mxu1 }
 0x27c   :  { %5034 = vmatpush3.bf16.xpose.msk.msra.mxu0 %vm6457_vm2, %v6625_v53  ;;  %v2597_v18 = vadd.f32 %v4845_v17, %v6374_v28  ;;  %v2591_v20 = vpop.f32.mrb[97].mxu1 }
 0x27d   :  { %5037 = vmatprep.subr.msk.bf16.mxu0 %vm6457_vm2, %v5035_v9  ;;  %v5053_v5 = vpack.c.bf16 %v2845_v15, %v2844_v47  ;;  %v2592_v21 = vadd.f32 %v6374_v28, %v2591_v20 }
 0x27e   :  { %v2847_v22 = vmax.f32 %v2597_v18, 0.0 }
 0x27f   :  { %v2846_v24 = vmax.f32 %v2592_v21, 0.0  ;;  %v4848_v13 = vpop.f32.mrb[98].mxu1 }
 0x280   :  { %v2607_v26 = vadd.f32 %v4848_v13, %v6374_v28  ;;  %v2601_v29 = vpop.f32.mrb[99].mxu1 }
 0x281   :  { %v6695_v30 = vpack.c.bf16 %v2847_v22, %v2846_v24  ;;  %v2602_v23 = vadd.f32 %v6374_v28, %v2601_v29 }
 0x282   :  { %v2849_v53 = vmax.f32 %v2607_v26, 0.0 }
 0x283   :  { %v2848_v31 = vmax.f32 %v2602_v23, 0.0  ;;  %v4851_v25 = vpop.f32.mrb[100].mxu1 }
 0x284   :  { %5040 = vmatpush3.bf16.xpose.msk.msra.mxu0 %vm6457_vm2, %v6629_v61  ;;  %v2617_v58 = vadd.f32 %v4851_v25, %v6374_v28  ;;  %v2611_v35 = vpop.f32.mrb[101].mxu1 }
 0x285   :  { %5043 = vmatprep.subr.msk.bf16.mxu0 %vm6457_vm2, %v5041_v6  ;;  %v6704_v36 = vpack.c.bf16 %v2849_v53, %v2848_v31  ;;  %v2612_v38 = vadd.f32 %v6374_v28, %v2611_v35 }
 0x286   :  { %v2851_v19 = vmax.f32 %v2617_v58, 0.0 }
 0x287   :  { %v2850_v40 = vmax.f32 %v2612_v38, 0.0  ;;  %v4854_v42 = vpop.f32.mrb[102].mxu1 }
 0x288   :  { %v2627_v27 = vadd.f32 %v4854_v42, %v6374_v28  ;;  %v2621_v33 = vpop.f32.mrb[103].mxu1 }
 0x289   :  { %v6708_v43 = vpack.c.bf16 %v2851_v19, %v2850_v40  ;;  %v2622_v61 = vadd.f32 %v6374_v28, %v2621_v33 }
 0x28a   :  { %v2853_v45 = vmax.f32 %v2627_v27, 0.0 }
 0x28b   :  { %v2852_v46 = vmax.f32 %v2622_v61, 0.0  ;;  %v4857_v2 = vpop.f32.mrb[104].mxu1 }
 0x28c   :  { %5046 = vmatpush3.bf16.xpose.msk.msra.mxu0 %vm6457_vm2, %v6638_v4  ;;  %v2637_v48 = vadd.f32 %v4857_v2, %v6374_v28  ;;  %v2631_v37 = vpop.f32.mrb[105].mxu1 }
 0x28d   :  { %v6715_v49 = vpack.c.bf16 %v2853_v45, %v2852_v46  ;;  %5049 = vmatprep.subr.msk.bf16.mxu0 %vm6457_vm2, %v5047_v12  ;;  %v2632_v51 = vadd.f32 %v6374_v28, %v2631_v37 }
 0x28e   :  { %v2855_v52 = vmax.f32 %v2637_v48, 0.0 }
 0x28f   :  { %v2854_v54 = vmax.f32 %v2632_v51, 0.0  ;;  %v4860_v41 = vpop.f32.mrb[106].mxu1 }
 0x290   :  { %v2647_v4 = vadd.f32 %v6723_v56, %v4860_v41  ;;  %v2641_v57 = vpop.f32.mrb[107].mxu1 }
 0x291   :  { %v6726_v59 = vpack.c.bf16 %v2855_v52, %v2854_v54  ;;  %v2642_v60 = vadd.f32 %v6723_v56, %v2641_v57 }
 0x292   :  { %v2857_v9 = vmax.f32 %v2647_v4, 0.0 }
 0x293   :  { %v2856_v62 = vmax.f32 %v2642_v60, 0.0  ;;  %v4863_v0 = vpop.f32.mrb[108].mxu1 }
 0x294   :  { %5052 = vmatpush3.bf16.xpose.msk.msra.mxu0 %vm6457_vm2, %v6642_v11  ;;  %v2657_v28 = vadd.f32 %v6723_v56, %v4863_v0  ;;  %v2651_v39 = vpop.f32.mrb[109].mxu1 }
 0x295   :  { %v6733_v1 = vpack.c.bf16 %v2857_v9, %v2856_v62  ;;  %v2652_v3 = vadd.f32 %v6723_v56, %v2651_v39  ;;  %5055 = vmatprep.subr.msk.bf16.mxu0 %vm6457_vm2, %v5053_v5 }
 0x296   :  { %v2859_v44 = vmax.f32 %v2657_v28, 0.0 }
 0x297   :  { %v2858_v6 = vmax.f32 %v2652_v3, 0.0  ;;  %v4866_v55 = vpop.f32.mrb[110].mxu1 }
 0x298   :  { %v2667_v7 = vadd.f32 %v6723_v56, %v4866_v55  ;;  %v2661_v8 = vpop.f32.mrb[111].mxu1 }
 0x299   :  { %v6739_v63 = vpack.c.bf16 %v2859_v44, %v2858_v6  ;;  %v2662_v11 = vadd.f32 %v6723_v56, %v2661_v8 }
 0x29a   :  { %v2861_v10 = vmax.f32 %v2667_v7, 0.0 }
 0x29b   :  { %v2860_v16 = vmax.f32 %v2662_v11, 0.0  ;;  %v4869_v12 = vpop.f32.mrb[112].mxu1 }
 0x29c   :  { %v2677_v14 = vadd.f32 %v6723_v56, %v4869_v12  ;;  %v2671_v15 = vpop.f32.mrb[113].mxu1  ;;  %5058 = vmatpush3.bf16.xpose.msk.msra.mxu0 %vm6457_vm2, %v6649_v50 }
 0x29d   :  { %v6746_v47 = vpack.c.bf16 %v2861_v10, %v2860_v16  ;;  %v2672_v17 = vadd.f32 %v6723_v56, %v2671_v15 }
 0x29e   :  { %v2863_v18 = vmax.f32 %v2677_v14, 0.0 }
 0x29f   :  { %v2862_v20 = vmax.f32 %v2672_v17, 0.0  ;;  %v4872_v5 = vpop.f32.mrb[114].mxu1 }
 0x2a0   :  { %v2687_v21 = vadd.f32 %v6723_v56, %v4872_v5  ;;  %v2681_v22 = vpop.f32.mrb[115].mxu1 }
 0x2a1   :  { %v5059_v24 = vpack.c.bf16 %v2863_v18, %v2862_v20  ;;  %v2682_v13 = vadd.f32 %v6723_v56, %v2681_v22 }
 0x2a2   :  { %v2865_v26 = vmax.f32 %v2687_v21, 0.0 }
 0x2a3   :  { %5061 = vmatprep.subr.msk.bf16.mxu1 %vm6457_vm2, %v5059_v24  ;;  %v2864_v29 = vmax.f32 %v2682_v13, 0.0  ;;  %v4875_v23 = vpop.f32.mrb[116].mxu1  ;;  %4448 = vmatmul.mubr.msk.f32.vlgmr.msra.gmra.mrb[130].mxu0 %vm1660_vm1, %v6466_v32 }
 0x2a4   :  { %5064 = vmatpush3.bf16.xpose.msk.msra.mxu1 %vm6457_vm2, %v6695_v30  ;;  %v2697_v50 = vadd.f32 %v6723_v56, %v4875_v23  ;;  %v2691_v53 = vpop.f32.mrb[117].mxu1 }
 0x2a5   :  { %v5065_v31 = vpack.c.bf16 %v2865_v26, %v2864_v29  ;;  %v2692_v25 = vadd.f32 %v6723_v56, %v2691_v53 }
 0x2a6   :  { %v2867_v58 = vmax.f32 %v2697_v50, 0.0 }
 0x2a7   :  { %5067 = vmatprep.subr.msk.bf16.mxu1 %vm6457_vm2, %v5065_v31  ;;  %v2866_v35 = vmax.f32 %v2692_v25, 0.0  ;;  %v4878_v38 = vpop.f32.mrb[118].mxu1 }
 0x2a8   :  { %v2707_v19 = vadd.f32 %v6723_v56, %v4878_v38  ;;  %v2701_v40 = vpop.f32.mrb[119].mxu1  ;;  %v5170_v38 = vmov 1966171168  }
 0x2a9   :  { %v5071_v42 = vpack.c.bf16 %v2867_v58, %v2866_v35  ;;  %v2702_v27 = vadd.f32 %v6723_v56, %v2701_v40 }
 0x2aa   :  { %v2869_v33 = vmax.f32 %v2707_v19, 0.0  ;;  %v3621_v19 = vunpack.c.l.s4 %v5170_v38 }
 0x2ab   :  { %v2868_v30 = vmax.f32 %v2702_v27, 0.0  ;;  %v4881_v61 = vpop.f32.mrb[120].mxu1 }
 0x2ac   :  { %5070 = vmatpush3.bf16.xpose.msk.msra.mxu1 %vm6457_vm2, %v6704_v36  ;;  %v2717_v45 = vadd.f32 %v6723_v56, %v4881_v61  ;;  %v2711_v46 = vpop.f32.mrb[121].mxu1  ;;  %v3622_v40 = vunpack.c.0.s8 %v3621_v19 }
 0x2ad   :  { %5073 = vmatprep.subr.msk.bf16.mxu1 %vm6457_vm2, %v5071_v42  ;;  %v5077_v2 = vpack.c.bf16 %v2869_v33, %v2868_v30  ;;  %v2712_v48 = vadd.f32 %v6723_v56, %v2711_v46 }
 0x2ae   :  { %v2871_v37 = vmax.f32 %v2717_v45, 0.0 }
 0x2af   :  { %v2870_v51 = vmax.f32 %v2712_v48, 0.0  ;;  %v4884_v52 = vpop.f32.mrb[122].mxu1 }
 0x2b0   :  { %v2727_v54 = vadd.f32 %v6723_v56, %v4884_v52  ;;  %v2721_v41 = vpop.f32.mrb[123].mxu1 }
 0x2b1   :  { %v5083_v4 = vpack.c.bf16 %v2871_v37, %v2870_v51  ;;  %v2722_v57 = vadd.f32 %v6723_v56, %v2721_v41 }
 0x2b2   :  { %v2873_v60 = vmax.f32 %v2727_v54, 0.0 }
 0x2b3   :  { %v2872_v36 = vmax.f32 %v2722_v57, 0.0  ;;  %v4887_v9 = vpop.f32.mrb[124].mxu1 }
 0x2b4   :  { %5076 = vmatpush3.bf16.xpose.msk.msra.mxu1 %vm6457_vm2, %v6708_v43  ;;  %v2737_v62 = vadd.f32 %v6723_v56, %v4887_v9  ;;  %v2731_v0 = vpop.f32.mrb[125].mxu1 }
 0x2b5   :  { %5079 = vmatprep.subr.msk.bf16.mxu1 %vm6457_vm2, %v5077_v2  ;;  %v5089_v28 = vpack.c.bf16 %v2873_v60, %v2872_v36  ;;  %v2732_v39 = vadd.f32 %v6723_v56, %v2731_v0 }
 0x2b6   :  { %v2875_v3 = vmax.f32 %v2737_v62, 0.0 }
 0x2b7   :  { %v2874_v44 = vmax.f32 %v2732_v39, 0.0  ;;  %v4890_v6 = vpop.f32.mrb[126].mxu1 }
 0x2b8   :  { %v2747_v55 = vadd.f32 %v6723_v56, %v4890_v6  ;;  %v2741_v7 = vpop.f32.mrb[127].mxu1 }
 0x2b9   :  { %v5095_v8 = vpack.c.bf16 %v2875_v3, %v2874_v44  ;;  %v2742_v11 = vadd.f32 %v6723_v56, %v2741_v7 }
 0x2ba   :  { %v2877_v10 = vmax.f32 %v2747_v55, 0.0 }
 0x2bb   :  { %v2876_v43 = vmax.f32 %v2742_v11, 0.0 }
 0x2bc   :  { %5082 = vmatpush3.bf16.xpose.msk.msra.mxu1 %vm6457_vm2, %v6715_v49  ;;  %v2885_v49 = vlaneseq }
 0x2bd   :  { %5085 = vmatprep.subr.msk.bf16.mxu1 %vm6457_vm2, %v5083_v4  ;;  %v5101_v16 = vpack.c.bf16 %v2877_v10, %v2876_v43 }
 0x2be   :  { %v2886_v56 = vshrl.u32 %v2885_v49, 7 }
 0x2c0   :  { %v3625_v42 = vsub.s32 %v3622_v40, %v2886_v56 }
 0x2c4   :  { %5088 = vmatpush3.bf16.xpose.msk.msra.mxu1 %vm6457_vm2, %v6726_v59  ;;  %v2887_v59 = vsub.s32 0, %v2886_v56 }
 0x2c5   :  { %5091 = vmatprep.subr.msk.bf16.mxu1 %vm6457_vm2, %v5089_v28 }
 0x2cc   :  { %5094 = vmatpush3.bf16.xpose.msk.msra.mxu1 %vm6457_vm2, %v6733_v1  ;;  %v2883_v1 = vpop.permute.xlu0 %2882 }
 0x2cd   :  { %5097 = vmatprep.subr.msk.bf16.mxu1 %vm6457_vm2, %v5095_v8  ;;  %v2888_v12 = vrot.slane %v2883_v1, %v2887_v59 }
 0x2d4   :  { %5100 = vmatpush3.bf16.xpose.msk.msra.mxu1 %vm6457_vm2, %v6739_v63 }
 0x2d5   :  { %5103 = vmatprep.subr.msk.bf16.mxu1 %vm6457_vm2, %v5101_v16 }
 0x2dc   :  { %5106 = vmatpush3.bf16.xpose.msk.msra.mxu1 %vm6457_vm2, %v6746_v47 }
 0x2e3   :  { %4482 = vmatmul.mubr.msk.f32.vlgmr.msra.gmra.mrb[130].mxu1 %vm1660_vm1, %v6466_v32 }
 0x2f6   :  { %v3342_v14 = vpop.f32.mrb[128].mxu0 }
 0x2f7   :  { %v3344_v15 = vpop.f32.mrb[129].mxu0  ;;  %v3343_v18 = vadd.f32 %v3342_v14, %v2888_v12 }
 0x2f8   :  { %v3345_v17 = vadd.f32 %v3344_v15, %v2888_v12 }
 0x2f9   :  { %v4071_v20 = vmul.f32 -1.442695, %v3343_v18 }
 0x2fa   :  { %v4072_v63 = vmul.f32 -1.442695, %v3345_v17 }
 0x2fc   :  { %5111 = vpow2.f32 %v4072_v63 }
 0x2fd   :  { %5113 = vpow2.f32 %v4071_v20 }
 0x306   :  { %v5112_v5 = vpop.eup %5111 }
 0x307   :  { %v5114_v21 = vpop.eup %5113  ;;  %v3585_v34 = vadd.f32 1.0, %v5112_v5 }
 0x308   :  { %v3584_v47 = vadd.f32 1.0, %v5114_v21 }
 0x309   :  { %5115 = vrcp.f32 %v3585_v34 }
 0x30a   :  { %5117 = vrcp.f32 %v3584_v47 }
 0x313   :  { %v5116_v32 = vpop.eup %5115 }
 0x314   :  { %v5118_v22 = vpop.eup %5117 }
 0x315   :  { %v3616_v24 = vcombine.low %v5118_v22, %v5116_v32 }
 0x317   :  { %v3626_v61 = vrot.slane %v3616_v24, %v3625_v42 }
 0x336   :  { %v3413_v13 = vpop.f32.mrb[128].mxu1 }
 0x337   :  { %v3415_v26 = vpop.f32.mrb[129].mxu1  ;;  %v3414_v29 = vadd.f32 %v3413_v13, %v2888_v12 }
 0x338   :  { %v3416_v23 = vadd.f32 %v3415_v26, %v2888_v12 }
 0x339   :  { %v4073_v50 = vmul.f32 -1.442695, %v3414_v29 }
 0x33a   :  { %v4074_v53 = vmul.f32 -1.442695, %v3416_v23 }
 0x33b   :  { %5119 = vpow2.f32 %v4073_v50 }
 0x33c   :  { %5121 = vpow2.f32 %v4074_v53 }
 0x345   :  { %v5120_v31 = vpop.eup %5119 }
 0x346   :  { %v5122_v25 = vpop.eup %5121  ;;  %v3586_v58 = vadd.f32 1.0, %v5120_v31 }
 0x347   :  { %v3587_v35 = vadd.f32 1.0, %v5122_v25 }
 0x348   :  { %5123 = vrcp.f32 %v3586_v58 }
 0x349   :  { %5125 = vrcp.f32 %v3587_v35 }
 0x352   :  { %v5124_v27 = vpop.eup %5123 }
 0x353   :  { %v5126_v33 = vpop.eup %5125 }
 0x354   :  { %v3617_v30 = vcombine.low %v5124_v27, %v5126_v33 }
 0x356   :  { %v3633_v45 = vrot.slane %v3617_v30, %v3625_v42 }
 0x358   :  { %v3648_v46 = vcombine.low %v3626_v61, %v3633_v45 }
 0x35a   :  { %v3656_v1 = vrot.slane %v3648_v46, %v3625_v42 }
 0x376   :  { %v3484_v2 = vpop.f32.mrb[130].mxu0 }
 0x377   :  { %v3485_v48 = vadd.f32 %v3484_v2, %v2888_v12  ;;  %v3486_v37 = vpop.f32.mrb[131].mxu0 }
 0x378   :  { %v3487_v51 = vadd.f32 %v3486_v37, %v2888_v12 }
 0x379   :  { %v4075_v52 = vmul.f32 -1.442695, %v3485_v48 }
 0x37a   :  { %v4076_v54 = vmul.f32 -1.442695, %v3487_v51 }
 0x37b   :  { %5127 = vpow2.f32 %v4075_v52 }
 0x37c   :  { %5129 = vpow2.f32 %v4076_v54 }
 0x385   :  { %v5128_v41 = vpop.eup %5127 }
 0x386   :  { %v5130_v4 = vpop.eup %5129  ;;  %v3588_v57 = vadd.f32 1.0, %v5128_v41 }
 0x387   :  { %v3589_v60 = vadd.f32 1.0, %v5130_v4 }
 0x388   :  { %5131 = vrcp.f32 %v3588_v57 }
 0x389   :  { %5133 = vrcp.f32 %v3589_v60 }
 0x392   :  { %v5132_v36 = vpop.eup %5131 }
 0x393   :  { %v5134_v9 = vpop.eup %5133 }
 0x394   :  { %v3618_v62 = vcombine.low %v5132_v36, %v5134_v9 }
 0x396   :  { %v3640_v49 = vrot.slane %v3618_v62, %v3625_v42 }
 0x3b6   :  { %v3555_v0 = vpop.f32.mrb[130].mxu1 }
 0x3b7   :  { %v3556_v28 = vadd.f32 %v3555_v0, %v2888_v12  ;;  %v3557_v39 = vpop.f32.mrb[131].mxu1 }
 0x3b8   :  { %v3558_v3 = vadd.f32 %v3557_v39, %v2888_v12 }
 0x3b9   :  { %v4077_v44 = vmul.f32 -1.442695, %v3556_v28 }
 0x3ba   :  { %v4078_v6 = vmul.f32 -1.442695, %v3558_v3 }
 0x3bb   :  { %5135 = vpow2.f32 %v4077_v44 }
 0x3bc   :  { %5137 = vpow2.f32 %v4078_v6 }
 0x3c5   :  { %v5136_v55 = vpop.eup %5135 }
 0x3c6   :  { %v5138_v7 = vpop.eup %5137  ;;  %v3590_v8 = vadd.f32 1.0, %v5136_v55 }
 0x3c7   :  { %v3591_v11 = vadd.f32 1.0, %v5138_v7 }
 0x3c8   :  { %5139 = vrcp.f32 %v3590_v8 }
 0x3c9   :  { %5141 = vrcp.f32 %v3591_v11 }
 0x3d2   :  { %v5140_v10 = vpop.eup %5139 }
 0x3d3   :  { %v5142_v43 = vpop.eup %5141 }
 0x3d4   :  { %v3619_v16 = vcombine.low %v5140_v10, %v5142_v43 }
 0x3d6   :  { %v3647_v56 = vrot.slane %v3619_v16, %v3625_v42 }
 0x3d8   :  { %v3649_v59 = vcombine.low %v3640_v49, %v3647_v56 }
 0x3da   :  { %v3663_v12 = vrot.slane %v3649_v59, %v3625_v42 }
 0x3dc   :  { %v3664_v14 = vcombine.low %v3656_v1, %v3663_v12 }
 0x3de   :  { %3666 = vst [vmem:[#allocation3] sm:$0xff] %v3664_v14 }
 0x3df   :  { %5156 = shalt.err (!%p5153_p4)
}
 0x3e0   :  { %s5157_s11 = scalar_lea.hbm %s6827_s8, 128 }
 0x3e1   :  { %p5158_p5 = scmp.ne.s32.totalorder %s6827_s8, %s5157_s11  ;;  %p5161_p6 = scmp.lt.u32.totalorder %s5157_s11, %s6827_s8 }
 0x3e3   :  { %p5163_p7 = pnand %p5161_p6, %p5158_p5 }
 0x3e5   :  { %5166 = shalt.err (!%p5163_p7)
}
 0x3e6   :  { %3676 = dma.vmem_to_hbm [thread:$0]  %s3674_s30, 128, %s6827_s8, [#allocation4]  }
 0x3e7   :  { %5167 = dma.done.wait [#allocation4], 128  }
 0x3e8   :  { %5168 = vsyncadd [#allocation4], 4294967168 }
 0x3e9   :  { %3680 = vsyncpa [#allocation4], 1 }

</bundles_post_ra>
